<compile_context>
chip_gen: v5e
topology: v5e:2x2
jax: 0.10.0
libtpu: 0.0.40
codegen_flags: <defaults>
</compile_context>

<pallas_src>
import functools

import jax
import jax.numpy as jnp
from jax import lax
from jax.experimental import pallas as pl
from jax.experimental.pallas import tpu as pltpu


# ----------------------------------- kernel -----------------------------------

def _gat_kernel(num_heads, d,
                vf_ref, rel_ref, kt_ref,
                wqv_ref, bqv_ref,
                w1_ref, b1_ref, w2_ref, b2_ref,
                out_ref, att_ref):
    tq = out_ref.shape[0]
    n = kt_ref.shape[-1]
    c_out = num_heads * d

    vf_tile = vf_ref[...].astype(jnp.float32)                          # [TQ, C_in]

    # Fused Q|V projection for this tile's rows (K was hoisted out of the grid).
    qv = jnp.dot(vf_tile, wqv_ref[...],
                 preferred_element_type=jnp.float32) + bqv_ref[...]    # [TQ, 2*C_out]

    # Pass 1: raw per-head scores staged in the att output VMEM block; running max
    # ACROSS HEADS (PyTorch softmax(dim=-1) on [N, N, H] normalizes over heads).
    m = jnp.full((tq, n), -jnp.inf, jnp.float32)
    for h in range(num_heads):   # TODO(synk): switch to lax.fori_loop(unroll=True) for large H
        q_h = qv[:, h * d:(h + 1) * d]                                 # [TQ, d]
        s_h = jnp.dot(q_h, kt_ref[h],
                      preferred_element_type=jnp.float32) + rel_ref[h]  # [TQ, N]
        att_ref[h] = s_h
        m = jnp.maximum(m, s_h)

    # Pass 2: exponentials (overwrite in place), accumulate denominator across heads.
    denom = jnp.zeros((tq, n), jnp.float32)
    for h in range(num_heads):
        e_h = jnp.exp(att_ref[h] - m)
        att_ref[h] = e_h
        denom = denom + e_h
    inv = pl.reciprocal(denom, approx=False)   # approx=True only after re-validating att tol

    # Pass 3: normalize in place (final attention values) + aggregate with the
    # query-row value vector:  attn_out[n, :] = sum_h (sum_m att_h[n, m]) * v_h[n, :]
    attn_out = jnp.zeros((tq, d), jnp.float32)
    for h in range(num_heads):
        a_h = att_ref[h] * inv
        att_ref[h] = a_h
        v_h = qv[:, c_out + h * d: c_out + (h + 1) * d]
        attn_out = attn_out + jnp.sum(a_h, axis=1, keepdims=True) * v_h

    hidden = jnp.dot(attn_out, w1_ref[...],
                     preferred_element_type=jnp.float32) + b1_ref[...]
    hidden = jnp.maximum(hidden, 0.0)                                   # ReLU
    out_ref[...] = jnp.dot(hidden, w2_ref[...],
                           preferred_element_type=jnp.float32) + b2_ref[...]


# ----------------------------- tiling / VMEM planning -----------------------------

def _vmem_capacity_bytes():
    try:
        return int(pltpu.get_tpu_info().vmem_capacity_bytes)
    except Exception:
        return 64 * 1024 * 1024   # conservative: v7x per-TC VMEM (smallest of v5e/v6e/v7x)


def _vmem_bytes_needed(tq, n, c_in, c_out, num_heads, d):
    f32 = 4
    rel_att = 4 * num_heads * tq * n * f32               # rel in + att out, double-buffered
    vf_out = 2 * (tq * c_in + tq * c_out) * f32          # vf in + output rows, double-buffered
    resident = 2 * (num_heads * d * n                    # kT
                    + c_in * 2 * c_out + 2 * c_out       # w_qv, b_qv
                    + d * c_out + c_out                  # w1, b1
                    + c_out * c_out + c_out) * f32       # w2, b2
    temps = (8 * tq * n + tq * 2 * c_out) * f32          # m/denom/e_h/a_h/s_h + qv
    return rel_att + vf_out + resident + temps


def _pick_tq(n, c_in, c_out, num_heads, d, vmem_cap):
    budget = int(0.85 * vmem_cap)

    def fits(tq):
        return _vmem_bytes_needed(tq, n, c_in, c_out, num_heads, d) <= budget

    # Prefer big tiles (amortize ~0.35us/step grid overhead) but keep grid >= 2 so both
    # v7x TensorCores get work; second-to-last block dim stays a multiple of 8.
    for tq in (512, 256, 128, 64, 32, 16, 8):
        if tq < n and n % tq == 0 and fits(tq):
            return tq
    # Any divisor of n that is a multiple of 8 and fits.
    upper = (min(n - 1, 512) // 8) * 8
    for tq in range(upper, 0, -8):
        if n % tq == 0 and fits(tq):
            return tq
    # Last resort: single block (correct, but no pipelining / megacore sharding).
    return n


# ----------------------------------- wrappers -----------------------------------

def gat_layer_forward_headmajor(vertex_features, relative_encoding_hnn,
                                kernel_params, num_heads):
    """vertex_features [N, C_in], relative_encoding_hnn [H, N, N] (head-major).
    Returns (output [N, C_out], attention [H, N, N]). Preferred (no glue transposes)."""
    wqv, bqv, wk, bk, w1, b1, w2, b2 = kernel_params
    n, c_in = vertex_features.shape
    c_out = w2.shape[-1]
    d = c_out // num_heads

    vf32 = vertex_features.astype(jnp.float32)
    rel32 = relative_encoding_hnn.astype(jnp.float32)

    # K projection hoisted out of the grid (grid-invariant), pre-transposed head-major.
    kf = jnp.dot(vf32, wk, precision=lax.Precision.HIGHEST) + bk          # [N, C_out]
    kt = jnp.transpose(kf.reshape(n, num_heads, d), (1, 2, 0))            # [H, d, N]

    vmem_cap = _vmem_capacity_bytes()
    tq = _pick_tq(n, c_in, c_out, num_heads, d, vmem_cap)
    grid = pl.cdiv(n, tq)

    in_specs = [
        pl.BlockSpec((tq, c_in), lambda i: (i, 0)),                # vf rows for this tile
        pl.BlockSpec((num_heads, tq, n), lambda i: (0, i, 0)),     # rel, row-tiled
        pl.BlockSpec((num_heads, d, n), lambda i: (0, 0, 0)),      # kT (resident)
        pl.BlockSpec((c_in, 2 * c_out), lambda i: (0, 0)),         # w_qv
        pl.BlockSpec((1, 2 * c_out), lambda i: (0, 0)),            # b_qv
        pl.BlockSpec((d, c_out), lambda i: (0, 0)),                # w1
        pl.BlockSpec((1, c_out), lambda i: (0, 0)),                # b1
        pl.BlockSpec((c_out, c_out), lambda i: (0, 0)),            # w2
        pl.BlockSpec((1, c_out), lambda i: (0, 0)),                # b2
    ]
    out_specs = (
        pl.BlockSpec((tq, c_out), lambda i: (i, 0)),               # output rows
        pl.BlockSpec((num_heads, tq, n), lambda i: (0, i, 0)),     # attention rows
    )

    needed = _vmem_bytes_needed(tq, n, c_in, c_out, num_heads, d)
    vmem_limit = int(min(int(0.9 * vmem_cap), max(2 * needed, 32 * 1024 * 1024)))

    flops = int(2 * n * c_in * 2 * c_out                # fused Q|V projection
                + 2 * num_heads * n * n * d             # score matmuls
                + 8 * num_heads * n * n                 # softmax / aggregation elementwise
                + 2 * n * d * c_out + 2 * n * c_out * c_out)   # MLP
    cost = pl.CostEstimate(
        flops=flops,
        transcendentals=int(num_heads * n * n + n * n),
        bytes_accessed=int(4 * (n * c_in + 2 * num_heads * n * n   # rel in + att out dominate
                                + num_heads * d * n + n * c_out
                                + c_in * 2 * c_out + d * c_out + c_out * c_out
                                + 5 * c_out)),
    )

    out, att_hnn = pl.pallas_call(
        functools.partial(_gat_kernel, num_heads, d),
        out_shape=(jax.ShapeDtypeStruct((n, c_out), jnp.float32),
                   jax.ShapeDtypeStruct((num_heads, n, n), jnp.float32)),
        grid_spec=pltpu.PrefetchScalarGridSpec(
            num_scalar_prefetch=0,
            grid=(grid,),
            in_specs=in_specs,
            out_specs=out_specs,
        ),
        compiler_params=pltpu.CompilerParams(
            dimension_semantics=("parallel",),
            vmem_limit_bytes=vmem_limit,
        ),
        cost_estimate=cost,
    )(vf32, rel32, kt, wqv, bqv, w1, b1, w2, b2)
    return out, att_hnn


def gat_layer_forward(vertex_features, relative_encoding, kernel_params, num_heads):
    """PyTorch-compatible interface: relative_encoding [N, N, H], attention out [N, N, H].
    For best HBM traffic keep rel/att head-major end-to-end and call
    gat_layer_forward_headmajor directly (each transpose here is an extra H*N*N
    HBM read+write in XLA on top of an already memory-bound kernel)."""
    rel_hnn = jnp.transpose(relative_encoding, (2, 0, 1))        # glue: -> [H, N, N]
    out, att_hnn = gat_layer_forward_headmajor(
        vertex_features, rel_hnn, kernel_params, num_heads)
    return out, jnp.transpose(att_hnn, (1, 2, 0))                # glue: -> [N, N, H]


# ------------------------- parameter setup (deterministic) -------------------------

def _torch_linear_init(key, fan_in, fan_out):
    """Mimics nn.Linear default init: U(-1/sqrt(fan_in), 1/sqrt(fan_in))."""
    kw, kb = jax.random.split(key)
    bound = 1.0 / jnp.sqrt(jnp.float32(fan_in))
    w = jax.random.uniform(kw, (fan_out, fan_in), jnp.float32, -bound, bound)
    b = jax.random.uniform(kb, (fan_out,), jnp.float32, -bound, bound)
    return w, b


def init_raw_params(key, c_in, c_out, num_heads):
    ks = jax.random.split(key, 5)
    d = c_out // num_heads
    wq, bq = _torch_linear_init(ks[0], c_in, c_out)
    wk, bk = _torch_linear_init(ks[1], c_in, c_out)
    wv, bv = _torch_linear_init(ks[2], c_in, c_out)
    w1, b1 = _torch_linear_init(ks[3], d, c_out)       # mlp[0]: Linear(d, c_out)
    w2, b2 = _torch_linear_init(ks[4], c_out, c_out)   # mlp[2]: Linear(c_out, c_out)
    return (wq, bq, wk, bk, wv, bv, w1, b1, w2, b2)


def to_kernel_params(raw, c_in, c_out, num_heads):
    wq, bq, wk, bk, wv, bv, w1, b1, w2, b2 = raw
    d = c_out // num_heads

    def headmajor_w(w):   # torch [C_out, C_in] row i*H+h -> [C_in, C_out] col h*d+i
        return jnp.transpose(w.reshape(d, num_heads, c_in), (1, 0, 2)).reshape(c_out, c_in).T

    def headmajor_b(b):   # torch [C_out] idx i*H+h -> idx h*d+i
        return jnp.transpose(b.reshape(d, num_heads), (1, 0)).reshape(c_out)

    w_qv = jnp.concatenate([headmajor_w(wq), headmajor_w(wv)], axis=1)   # [C_in, 2*C_out]
    b_qv = jnp.concatenate([headmajor_b(bq), headmajor_b(bv)])[None, :]  # [1, 2*C_out]
    w_k = headmajor_w(wk)
    b_k = headmajor_b(bk)[None, :]
    return (w_qv, b_qv, w_k, b_k,
            jnp.transpose(w1), b1[None, :],
            jnp.transpose(w2), b2[None, :])


# ------------------------- pure-JAX reference (PyTorch semantics) -------------------------

def reference_forward(vf, rel, raw, num_heads, c_out):
    hi = lax.Precision.HIGHEST
    wq, bq, wk, bk, wv, bv, w1, b1, w2, b2 = raw
    n = vf.shape[0]
    d = c_out // num_heads
    q = (jnp.dot(vf, wq.T, precision=hi) + bq).reshape(n, d, num_heads)
    k = (jnp.dot(vf, wk.T, precision=hi) + bk).reshape(n, d, num_heads)
    v = (jnp.dot(vf, wv.T, precision=hi) + bv).reshape(n, d, num_heads)
    kt = jnp.transpose(k, (2, 1, 0))                                  # [H, d, N]
    qp = jnp.transpose(q, (2, 0, 1))                                  # [H, N, d]
    att = jnp.transpose(jnp.matmul(qp, kt, precision=hi), (1, 2, 0))  # [N, N, H]
    att = jax.nn.softmax(att + rel, axis=-1)                          # softmax over heads
    vt = jnp.transpose(v, (0, 2, 1))                                  # [N, H, d]
    ao = jnp.matmul(att, vt, precision=hi).sum(axis=1).reshape(n, -1) # [N, d]
    hidden = jnp.maximum(jnp.dot(ao, w1.T, precision=hi) + b1, 0.0)
    out = jnp.dot(hidden, w2.T, precision=hi) + b2
    return out, att


if __name__ == "__main__":
    N_NODES = 64
    C_IN = 16
    C_OUT = 32
    N_HEADS = 4

    key = jax.random.PRNGKey(0)
    k_param, k_vf, k_rel = jax.random.split(key, 3)

    raw_params = init_raw_params(k_param, C_IN, C_OUT, N_HEADS)
    kern_params = to_kernel_params(raw_params, C_IN, C_OUT, N_HEADS)

    vertex_features = jax.random.normal(k_vf, (N_NODES, C_IN), jnp.float32)
    relative_encoding = 0.1 * jax.random.normal(
        k_rel, (N_NODES, N_NODES, N_HEADS), jnp.float32)

    out, att = gat_layer_forward(vertex_features, relative_encoding, kern_params, N_HEADS)
    out = jax.block_until_ready(out)
    att = jax.block_until_ready(att)

    out_ref, att_ref = reference_forward(vertex_features, relative_encoding,
                                         raw_params, N_HEADS, C_OUT)

    assert out.shape == (N_NODES, C_OUT)
    assert att.shape == (N_NODES, N_NODES, N_HEADS)
    # Tolerances leave headroom for MXU f32 pass-decomposition differences vs the
    # HIGHEST-precision XLA reference; real layout/semantics bugs are 100-1000x larger.
    assert jnp.allclose(out, out_ref, atol=5e-2, rtol=5e-3)
    assert jnp.allclose(att, att_ref, atol=2e-3, rtol=5e-3)

    print("KERNEL_OK")
</pallas_src>

<mosaic_0001>
module attributes {stable_mosaic.version = 11 : i64} {
  func.func @_gat_kernel(%arg0: i32, %arg1: memref<32x16xf32, #tpu.memory_space<vmem>>, %arg2: memref<4x32x64xf32, #tpu.memory_space<vmem>>, %arg3: memref<4x8x64xf32, #tpu.memory_space<vmem>>, %arg4: memref<16x64xf32, #tpu.memory_space<vmem>>, %arg5: memref<1x64xf32, #tpu.memory_space<vmem>>, %arg6: memref<8x32xf32, #tpu.memory_space<vmem>>, %arg7: memref<1x32xf32, #tpu.memory_space<vmem>>, %arg8: memref<32x32xf32, #tpu.memory_space<vmem>>, %arg9: memref<1x32xf32, #tpu.memory_space<vmem>>, %arg10: memref<32x32xf32, #tpu.memory_space<vmem>>, %arg11: memref<4x32x64xf32, #tpu.memory_space<vmem>>) attributes {dimension_semantics = [#tpu.dimension_semantics<parallel>], iteration_bounds = array<i64: 2>, scalar_prefetch = 0 : i64, scratch_operands = 0 : i64, tpu.core_type = #tpu.core_type<tc>, window_params = [{transform_indices = @transform_0, window_bounds = array<i64: 32, 16>}, {transform_indices = @transform_1, window_bounds = array<i64: 4, 32, 64>}, {pipeline_mode = #tpu.pipeline_mode<synchronous>, transform_indices = @transform_2, window_bounds = array<i64: 4, 8, 64>}, {pipeline_mode = #tpu.pipeline_mode<synchronous>, transform_indices = @transform_3, window_bounds = array<i64: 16, 64>}, {pipeline_mode = #tpu.pipeline_mode<synchronous>, transform_indices = @transform_4, window_bounds = array<i64: 1, 64>}, {pipeline_mode = #tpu.pipeline_mode<synchronous>, transform_indices = @transform_5, window_bounds = array<i64: 8, 32>}, {pipeline_mode = #tpu.pipeline_mode<synchronous>, transform_indices = @transform_6, window_bounds = array<i64: 1, 32>}, {pipeline_mode = #tpu.pipeline_mode<synchronous>, transform_indices = @transform_7, window_bounds = array<i64: 32, 32>}, {pipeline_mode = #tpu.pipeline_mode<synchronous>, transform_indices = @transform_8, window_bounds = array<i64: 1, 32>}, {transform_indices = @transform_9, window_bounds = array<i64: 32, 32>}, {transform_indices = @transform_10, window_bounds = array<i64: 4, 32, 64>}]} {
    %c0 = arith.constant 0 : index
    %c0_0 = arith.constant 0 : index
    %0 = vector.load %arg1[%c0, %c0_0] : memref<32x16xf32, #tpu.memory_space<vmem>>, vector<32x16xf32>
    %c0_1 = arith.constant 0 : index
    %c0_2 = arith.constant 0 : index
    %1 = vector.load %arg4[%c0_1, %c0_2] : memref<16x64xf32, #tpu.memory_space<vmem>>, vector<16x64xf32>
    %cst = arith.constant dense<0.000000e+00> : vector<32x64xf32>
    %2 = tpu.matmul %0, %1, %cst {dimension_numbers = #tpu.dot_dimension_numbers<[1], [0], [0], [1], [0, 0, 1, 1], [], []>} : vector<32x16xf32>, vector<16x64xf32>, vector<32x64xf32> -> vector<32x64xf32>
    %c0_3 = arith.constant 0 : index
    %c0_4 = arith.constant 0 : index
    %3 = vector.load %arg5[%c0_3, %c0_4] : memref<1x64xf32, #tpu.memory_space<vmem>>, vector<1x64xf32>
    %4 = vector.broadcast %3 : vector<1x64xf32> to vector<32x64xf32>
    %5 = arith.addf %2, %4 : vector<32x64xf32>
    %cst_5 = arith.constant 0xFF800000 : f32
    %6 = vector.broadcast %cst_5 : f32 to vector<32x64xf32>
    %7 = vector.extract_strided_slice %5 {offsets = [0, 0], sizes = [32, 8], strides = [1, 1]} : vector<32x64xf32> to vector<32x8xf32>
    %c0_6 = arith.constant 0 : index
    %c0_7 = arith.constant 0 : index
    %c0_8 = arith.constant 0 : index
    %8 = vector.load %arg3[%c0_6, %c0_7, %c0_8] : memref<4x8x64xf32, #tpu.memory_space<vmem>>, vector<1x8x64xf32>
    %9 = vector.shape_cast %8 : vector<1x8x64xf32> to vector<8x64xf32>
    %cst_9 = arith.constant dense<0.000000e+00> : vector<32x64xf32>
    %10 = tpu.matmul %7, %9, %cst_9 {dimension_numbers = #tpu.dot_dimension_numbers<[1], [0], [0], [1], [0, 0, 1, 1], [], []>} : vector<32x8xf32>, vector<8x64xf32>, vector<32x64xf32> -> vector<32x64xf32>
    %c0_10 = arith.constant 0 : index
    %c0_11 = arith.constant 0 : index
    %c0_12 = arith.constant 0 : index
    %11 = vector.load %arg2[%c0_10, %c0_11, %c0_12] : memref<4x32x64xf32, #tpu.memory_space<vmem>>, vector<1x32x64xf32>
    %12 = vector.shape_cast %11 : vector<1x32x64xf32> to vector<32x64xf32>
    %13 = arith.addf %10, %12 : vector<32x64xf32>
    %c0_13 = arith.constant 0 : index
    %c0_14 = arith.constant 0 : index
    %c0_15 = arith.constant 0 : index
    %14 = vector.load %arg11[%c0_13, %c0_14, %c0_15] : memref<4x32x64xf32, #tpu.memory_space<vmem>>, vector<1x32x64xf32>
    %15 = vector.shape_cast %14 : vector<1x32x64xf32> to vector<32x64xf32>
    %16 = vector.shape_cast %13 : vector<32x64xf32> to vector<1x32x64xf32>
    tpu.vector_store %arg11[%c0_13, %c0_14, %c0_15], %16 {strides = array<i32>} : memref<4x32x64xf32, #tpu.memory_space<vmem>>, vector<1x32x64xf32>,
    %17 = arith.maximumf %6, %13 : vector<32x64xf32>
    %18 = vector.extract_strided_slice %5 {offsets = [0, 8], sizes = [32, 8], strides = [1, 1]} : vector<32x64xf32> to vector<32x8xf32>
    %c1 = arith.constant 1 : index
    %c0_16 = arith.constant 0 : index
    %c0_17 = arith.constant 0 : index
    %19 = vector.load %arg3[%c1, %c0_16, %c0_17] : memref<4x8x64xf32, #tpu.memory_space<vmem>>, vector<1x8x64xf32>
    %20 = vector.shape_cast %19 : vector<1x8x64xf32> to vector<8x64xf32>
    %cst_18 = arith.constant dense<0.000000e+00> : vector<32x64xf32>
    %21 = tpu.matmul %18, %20, %cst_18 {dimension_numbers = #tpu.dot_dimension_numbers<[1], [0], [0], [1], [0, 0, 1, 1], [], []>} : vector<32x8xf32>, vector<8x64xf32>, vector<32x64xf32> -> vector<32x64xf32>
    %c1_19 = arith.constant 1 : index
    %c0_20 = arith.constant 0 : index
    %c0_21 = arith.constant 0 : index
    %22 = vector.load %arg2[%c1_19, %c0_20, %c0_21] : memref<4x32x64xf32, #tpu.memory_space<vmem>>, vector<1x32x64xf32>
    %23 = vector.shape_cast %22 : vector<1x32x64xf32> to vector<32x64xf32>
    %24 = arith.addf %21, %23 : vector<32x64xf32>
    %c1_22 = arith.constant 1 : index
    %c0_23 = arith.constant 0 : index
    %c0_24 = arith.constant 0 : index
    %25 = vector.load %arg11[%c1_22, %c0_23, %c0_24] : memref<4x32x64xf32, #tpu.memory_space<vmem>>, vector<1x32x64xf32>
    %26 = vector.shape_cast %25 : vector<1x32x64xf32> to vector<32x64xf32>
    %27 = vector.shape_cast %24 : vector<32x64xf32> to vector<1x32x64xf32>
    tpu.vector_store %arg11[%c1_22, %c0_23, %c0_24], %27 {strides = array<i32>} : memref<4x32x64xf32, #tpu.memory_space<vmem>>, vector<1x32x64xf32>,
    %28 = arith.maximumf %17, %24 : vector<32x64xf32>
    %29 = vector.extract_strided_slice %5 {offsets = [0, 16], sizes = [32, 8], strides = [1, 1]} : vector<32x64xf32> to vector<32x8xf32>
    %c2 = arith.constant 2 : index
    %c0_25 = arith.constant 0 : index
    %c0_26 = arith.constant 0 : index
    %30 = vector.load %arg3[%c2, %c0_25, %c0_26] : memref<4x8x64xf32, #tpu.memory_space<vmem>>, vector<1x8x64xf32>
    %31 = vector.shape_cast %30 : vector<1x8x64xf32> to vector<8x64xf32>
    %cst_27 = arith.constant dense<0.000000e+00> : vector<32x64xf32>
    %32 = tpu.matmul %29, %31, %cst_27 {dimension_numbers = #tpu.dot_dimension_numbers<[1], [0], [0], [1], [0, 0, 1, 1], [], []>} : vector<32x8xf32>, vector<8x64xf32>, vector<32x64xf32> -> vector<32x64xf32>
    %c2_28 = arith.constant 2 : index
    %c0_29 = arith.constant 0 : index
    %c0_30 = arith.constant 0 : index
    %33 = vector.load %arg2[%c2_28, %c0_29, %c0_30] : memref<4x32x64xf32, #tpu.memory_space<vmem>>, vector<1x32x64xf32>
    %34 = vector.shape_cast %33 : vector<1x32x64xf32> to vector<32x64xf32>
    %35 = arith.addf %32, %34 : vector<32x64xf32>
    %c2_31 = arith.constant 2 : index
    %c0_32 = arith.constant 0 : index
    %c0_33 = arith.constant 0 : index
    %36 = vector.load %arg11[%c2_31, %c0_32, %c0_33] : memref<4x32x64xf32, #tpu.memory_space<vmem>>, vector<1x32x64xf32>
    %37 = vector.shape_cast %36 : vector<1x32x64xf32> to vector<32x64xf32>
    %38 = vector.shape_cast %35 : vector<32x64xf32> to vector<1x32x64xf32>
    tpu.vector_store %arg11[%c2_31, %c0_32, %c0_33], %38 {strides = array<i32>} : memref<4x32x64xf32, #tpu.memory_space<vmem>>, vector<1x32x64xf32>,
    %39 = arith.maximumf %28, %35 : vector<32x64xf32>
    %40 = vector.extract_strided_slice %5 {offsets = [0, 24], sizes = [32, 8], strides = [1, 1]} : vector<32x64xf32> to vector<32x8xf32>
    %c3 = arith.constant 3 : index
    %c0_34 = arith.constant 0 : index
    %c0_35 = arith.constant 0 : index
    %41 = vector.load %arg3[%c3, %c0_34, %c0_35] : memref<4x8x64xf32, #tpu.memory_space<vmem>>, vector<1x8x64xf32>
    %42 = vector.shape_cast %41 : vector<1x8x64xf32> to vector<8x64xf32>
    %cst_36 = arith.constant dense<0.000000e+00> : vector<32x64xf32>
    %43 = tpu.matmul %40, %42, %cst_36 {dimension_numbers = #tpu.dot_dimension_numbers<[1], [0], [0], [1], [0, 0, 1, 1], [], []>} : vector<32x8xf32>, vector<8x64xf32>, vector<32x64xf32> -> vector<32x64xf32>
    %c3_37 = arith.constant 3 : index
    %c0_38 = arith.constant 0 : index
    %c0_39 = arith.constant 0 : index
    %44 = vector.load %arg2[%c3_37, %c0_38, %c0_39] : memref<4x32x64xf32, #tpu.memory_space<vmem>>, vector<1x32x64xf32>
    %45 = vector.shape_cast %44 : vector<1x32x64xf32> to vector<32x64xf32>
    %46 = arith.addf %43, %45 : vector<32x64xf32>
    %c3_40 = arith.constant 3 : index
    %c0_41 = arith.constant 0 : index
    %c0_42 = arith.constant 0 : index
    %47 = vector.load %arg11[%c3_40, %c0_41, %c0_42] : memref<4x32x64xf32, #tpu.memory_space<vmem>>, vector<1x32x64xf32>
    %48 = vector.shape_cast %47 : vector<1x32x64xf32> to vector<32x64xf32>
    %49 = vector.shape_cast %46 : vector<32x64xf32> to vector<1x32x64xf32>
    tpu.vector_store %arg11[%c3_40, %c0_41, %c0_42], %49 {strides = array<i32>} : memref<4x32x64xf32, #tpu.memory_space<vmem>>, vector<1x32x64xf32>,
    %50 = arith.maximumf %39, %46 : vector<32x64xf32>
    %cst_43 = arith.constant 0.000000e+00 : f32
    %51 = vector.broadcast %cst_43 : f32 to vector<32x64xf32>
    %c0_44 = arith.constant 0 : index
    %c0_45 = arith.constant 0 : index
    %c0_46 = arith.constant 0 : index
    %52 = vector.load %arg11[%c0_44, %c0_45, %c0_46] : memref<4x32x64xf32, #tpu.memory_space<vmem>>, vector<1x32x64xf32>
    %53 = vector.shape_cast %52 : vector<1x32x64xf32> to vector<32x64xf32>
    %54 = arith.subf %53, %50 : vector<32x64xf32>
    %55 = math.exp %54 : vector<32x64xf32>
    %c0_47 = arith.constant 0 : index
    %c0_48 = arith.constant 0 : index
    %c0_49 = arith.constant 0 : index
    %56 = vector.load %arg11[%c0_47, %c0_48, %c0_49] : memref<4x32x64xf32, #tpu.memory_space<vmem>>, vector<1x32x64xf32>
    %57 = vector.shape_cast %56 : vector<1x32x64xf32> to vector<32x64xf32>
    %58 = vector.shape_cast %55 : vector<32x64xf32> to vector<1x32x64xf32>
    tpu.vector_store %arg11[%c0_47, %c0_48, %c0_49], %58 {strides = array<i32>} : memref<4x32x64xf32, #tpu.memory_space<vmem>>, vector<1x32x64xf32>,
    %59 = arith.addf %51, %55 : vector<32x64xf32>
    %c1_50 = arith.constant 1 : index
    %c0_51 = arith.constant 0 : index
    %c0_52 = arith.constant 0 : index
    %60 = vector.load %arg11[%c1_50, %c0_51, %c0_52] : memref<4x32x64xf32, #tpu.memory_space<vmem>>, vector<1x32x64xf32>
    %61 = vector.shape_cast %60 : vector<1x32x64xf32> to vector<32x64xf32>
    %62 = arith.subf %61, %50 : vector<32x64xf32>
    %63 = math.exp %62 : vector<32x64xf32>
    %c1_53 = arith.constant 1 : index
    %c0_54 = arith.constant 0 : index
    %c0_55 = arith.constant 0 : index
    %64 = vector.load %arg11[%c1_53, %c0_54, %c0_55] : memref<4x32x64xf32, #tpu.memory_space<vmem>>, vector<1x32x64xf32>
    %65 = vector.shape_cast %64 : vector<1x32x64xf32> to vector<32x64xf32>
    %66 = vector.shape_cast %63 : vector<32x64xf32> to vector<1x32x64xf32>
    tpu.vector_store %arg11[%c1_53, %c0_54, %c0_55], %66 {strides = array<i32>} : memref<4x32x64xf32, #tpu.memory_space<vmem>>, vector<1x32x64xf32>,
    %67 = arith.addf %59, %63 : vector<32x64xf32>
    %c2_56 = arith.constant 2 : index
    %c0_57 = arith.constant 0 : index
    %c0_58 = arith.constant 0 : index
    %68 = vector.load %arg11[%c2_56, %c0_57, %c0_58] : memref<4x32x64xf32, #tpu.memory_space<vmem>>, vector<1x32x64xf32>
    %69 = vector.shape_cast %68 : vector<1x32x64xf32> to vector<32x64xf32>
    %70 = arith.subf %69, %50 : vector<32x64xf32>
    %71 = math.exp %70 : vector<32x64xf32>
    %c2_59 = arith.constant 2 : index
    %c0_60 = arith.constant 0 : index
    %c0_61 = arith.constant 0 : index
    %72 = vector.load %arg11[%c2_59, %c0_60, %c0_61] : memref<4x32x64xf32, #tpu.memory_space<vmem>>, vector<1x32x64xf32>
    %73 = vector.shape_cast %72 : vector<1x32x64xf32> to vector<32x64xf32>
    %74 = vector.shape_cast %71 : vector<32x64xf32> to vector<1x32x64xf32>
    tpu.vector_store %arg11[%c2_59, %c0_60, %c0_61], %74 {strides = array<i32>} : memref<4x32x64xf32, #tpu.memory_space<vmem>>, vector<1x32x64xf32>,
    %75 = arith.addf %67, %71 : vector<32x64xf32>
    %c3_62 = arith.constant 3 : index
    %c0_63 = arith.constant 0 : index
    %c0_64 = arith.constant 0 : index
    %76 = vector.load %arg11[%c3_62, %c0_63, %c0_64] : memref<4x32x64xf32, #tpu.memory_space<vmem>>, vector<1x32x64xf32>
    %77 = vector.shape_cast %76 : vector<1x32x64xf32> to vector<32x64xf32>
    %78 = arith.subf %77, %50 : vector<32x64xf32>
    %79 = math.exp %78 : vector<32x64xf32>
    %c3_65 = arith.constant 3 : index
    %c0_66 = arith.constant 0 : index
    %c0_67 = arith.constant 0 : index
    %80 = vector.load %arg11[%c3_65, %c0_66, %c0_67] : memref<4x32x64xf32, #tpu.memory_space<vmem>>, vector<1x32x64xf32>
    %81 = vector.shape_cast %80 : vector<1x32x64xf32> to vector<32x64xf32>
    %82 = vector.shape_cast %79 : vector<32x64xf32> to vector<1x32x64xf32>
    tpu.vector_store %arg11[%c3_65, %c0_66, %c0_67], %82 {strides = array<i32>} : memref<4x32x64xf32, #tpu.memory_space<vmem>>, vector<1x32x64xf32>,
    %83 = arith.addf %75, %79 : vector<32x64xf32>
    %84 = tpu.reciprocal %83 : vector<32x64xf32> -> vector<32x64xf32>
    %cst_68 = arith.constant 0.000000e+00 : f32
    %85 = vector.broadcast %cst_68 : f32 to vector<32x8xf32>
    %c0_69 = arith.constant 0 : index
    %c0_70 = arith.constant 0 : index
    %c0_71 = arith.constant 0 : index
    %86 = vector.load %arg11[%c0_69, %c0_70, %c0_71] : memref<4x32x64xf32, #tpu.memory_space<vmem>>, vector<1x32x64xf32>
    %87 = vector.shape_cast %86 : vector<1x32x64xf32> to vector<32x64xf32>
    %88 = arith.mulf %87, %84 : vector<32x64xf32>
    %c0_72 = arith.constant 0 : index
    %c0_73 = arith.constant 0 : index
    %c0_74 = arith.constant 0 : index
    %89 = vector.load %arg11[%c0_72, %c0_73, %c0_74] : memref<4x32x64xf32, #tpu.memory_space<vmem>>, vector<1x32x64xf32>
    %90 = vector.shape_cast %89 : vector<1x32x64xf32> to vector<32x64xf32>
    %91 = vector.shape_cast %88 : vector<32x64xf32> to vector<1x32x64xf32>
    tpu.vector_store %arg11[%c0_72, %c0_73, %c0_74], %91 {strides = array<i32>} : memref<4x32x64xf32, #tpu.memory_space<vmem>>, vector<1x32x64xf32>,
    %92 = vector.extract_strided_slice %5 {offsets = [0, 32], sizes = [32, 8], strides = [1, 1]} : vector<32x64xf32> to vector<32x8xf32>
    %cst_75 = arith.constant dense<0.000000e+00> : vector<32xf32>
    %93 = vector.multi_reduction <add>, %88, %cst_75 [1] : vector<32x64xf32> to vector<32xf32>
    %94 = vector.shape_cast %93 : vector<32xf32> to vector<32x1xf32>
    %95 = vector.broadcast %94 : vector<32x1xf32> to vector<32x8xf32>
    %96 = arith.mulf %95, %92 : vector<32x8xf32>
    %97 = arith.addf %85, %96 : vector<32x8xf32>
    %c1_76 = arith.constant 1 : index
    %c0_77 = arith.constant 0 : index
    %c0_78 = arith.constant 0 : index
    %98 = vector.load %arg11[%c1_76, %c0_77, %c0_78] : memref<4x32x64xf32, #tpu.memory_space<vmem>>, vector<1x32x64xf32>
    %99 = vector.shape_cast %98 : vector<1x32x64xf32> to vector<32x64xf32>
    %100 = arith.mulf %99, %84 : vector<32x64xf32>
    %c1_79 = arith.constant 1 : index
    %c0_80 = arith.constant 0 : index
    %c0_81 = arith.constant 0 : index
    %101 = vector.load %arg11[%c1_79, %c0_80, %c0_81] : memref<4x32x64xf32, #tpu.memory_space<vmem>>, vector<1x32x64xf32>
    %102 = vector.shape_cast %101 : vector<1x32x64xf32> to vector<32x64xf32>
    %103 = vector.shape_cast %100 : vector<32x64xf32> to vector<1x32x64xf32>
    tpu.vector_store %arg11[%c1_79, %c0_80, %c0_81], %103 {strides = array<i32>} : memref<4x32x64xf32, #tpu.memory_space<vmem>>, vector<1x32x64xf32>,
    %104 = vector.extract_strided_slice %5 {offsets = [0, 40], sizes = [32, 8], strides = [1, 1]} : vector<32x64xf32> to vector<32x8xf32>
    %cst_82 = arith.constant dense<0.000000e+00> : vector<32xf32>
    %105 = vector.multi_reduction <add>, %100, %cst_82 [1] : vector<32x64xf32> to vector<32xf32>
    %106 = vector.shape_cast %105 : vector<32xf32> to vector<32x1xf32>
    %107 = vector.broadcast %106 : vector<32x1xf32> to vector<32x8xf32>
    %108 = arith.mulf %107, %104 : vector<32x8xf32>
    %109 = arith.addf %97, %108 : vector<32x8xf32>
    %c2_83 = arith.constant 2 : index
    %c0_84 = arith.constant 0 : index
    %c0_85 = arith.constant 0 : index
    %110 = vector.load %arg11[%c2_83, %c0_84, %c0_85] : memref<4x32x64xf32, #tpu.memory_space<vmem>>, vector<1x32x64xf32>
    %111 = vector.shape_cast %110 : vector<1x32x64xf32> to vector<32x64xf32>
    %112 = arith.mulf %111, %84 : vector<32x64xf32>
    %c2_86 = arith.constant 2 : index
    %c0_87 = arith.constant 0 : index
    %c0_88 = arith.constant 0 : index
    %113 = vector.load %arg11[%c2_86, %c0_87, %c0_88] : memref<4x32x64xf32, #tpu.memory_space<vmem>>, vector<1x32x64xf32>
    %114 = vector.shape_cast %113 : vector<1x32x64xf32> to vector<32x64xf32>
    %115 = vector.shape_cast %112 : vector<32x64xf32> to vector<1x32x64xf32>
    tpu.vector_store %arg11[%c2_86, %c0_87, %c0_88], %115 {strides = array<i32>} : memref<4x32x64xf32, #tpu.memory_space<vmem>>, vector<1x32x64xf32>,
    %116 = vector.extract_strided_slice %5 {offsets = [0, 48], sizes = [32, 8], strides = [1, 1]} : vector<32x64xf32> to vector<32x8xf32>
    %cst_89 = arith.constant dense<0.000000e+00> : vector<32xf32>
    %117 = vector.multi_reduction <add>, %112, %cst_89 [1] : vector<32x64xf32> to vector<32xf32>
    %118 = vector.shape_cast %117 : vector<32xf32> to vector<32x1xf32>
    %119 = vector.broadcast %118 : vector<32x1xf32> to vector<32x8xf32>
    %120 = arith.mulf %119, %116 : vector<32x8xf32>
    %121 = arith.addf %109, %120 : vector<32x8xf32>
    %c3_90 = arith.constant 3 : index
    %c0_91 = arith.constant 0 : index
    %c0_92 = arith.constant 0 : index
    %122 = vector.load %arg11[%c3_90, %c0_91, %c0_92] : memref<4x32x64xf32, #tpu.memory_space<vmem>>, vector<1x32x64xf32>
    %123 = vector.shape_cast %122 : vector<1x32x64xf32> to vector<32x64xf32>
    %124 = arith.mulf %123, %84 : vector<32x64xf32>
    %c3_93 = arith.constant 3 : index
    %c0_94 = arith.constant 0 : index
    %c0_95 = arith.constant 0 : index
    %125 = vector.load %arg11[%c3_93, %c0_94, %c0_95] : memref<4x32x64xf32, #tpu.memory_space<vmem>>, vector<1x32x64xf32>
    %126 = vector.shape_cast %125 : vector<1x32x64xf32> to vector<32x64xf32>
    %127 = vector.shape_cast %124 : vector<32x64xf32> to vector<1x32x64xf32>
    tpu.vector_store %arg11[%c3_93, %c0_94, %c0_95], %127 {strides = array<i32>} : memref<4x32x64xf32, #tpu.memory_space<vmem>>, vector<1x32x64xf32>,
    %128 = vector.extract_strided_slice %5 {offsets = [0, 56], sizes = [32, 8], strides = [1, 1]} : vector<32x64xf32> to vector<32x8xf32>
    %cst_96 = arith.constant dense<0.000000e+00> : vector<32xf32>
    %129 = vector.multi_reduction <add>, %124, %cst_96 [1] : vector<32x64xf32> to vector<32xf32>
    %130 = vector.shape_cast %129 : vector<32xf32> to vector<32x1xf32>
    %131 = vector.broadcast %130 : vector<32x1xf32> to vector<32x8xf32>
    %132 = arith.mulf %131, %128 : vector<32x8xf32>
    %133 = arith.addf %121, %132 : vector<32x8xf32>
    %c0_97 = arith.constant 0 : index
    %c0_98 = arith.constant 0 : index
    %134 = vector.load %arg6[%c0_97, %c0_98] : memref<8x32xf32, #tpu.memory_space<vmem>>, vector<8x32xf32>
    %cst_99 = arith.constant dense<0.000000e+00> : vector<32x32xf32>
    %135 = tpu.matmul %133, %134, %cst_99 {dimension_numbers = #tpu.dot_dimension_numbers<[1], [0], [0], [1], [0, 0, 1, 1], [], []>} : vector<32x8xf32>, vector<8x32xf32>, vector<32x32xf32> -> vector<32x32xf32>
    %c0_100 = arith.constant 0 : index
    %c0_101 = arith.constant 0 : index
    %136 = vector.load %arg7[%c0_100, %c0_101] : memref<1x32xf32, #tpu.memory_space<vmem>>, vector<1x32xf32>
    %137 = vector.broadcast %136 : vector<1x32xf32> to vector<32x32xf32>
    %138 = arith.addf %135, %137 : vector<32x32xf32>
    %cst_102 = arith.constant 0.000000e+00 : f32
    %139 = vector.broadcast %cst_102 : f32 to vector<32x32xf32>
    %140 = arith.maximumf %138, %139 : vector<32x32xf32>
    %c0_103 = arith.constant 0 : index
    %c0_104 = arith.constant 0 : index
    %141 = vector.load %arg8[%c0_103, %c0_104] : memref<32x32xf32, #tpu.memory_space<vmem>>, vector<32x32xf32>
    %cst_105 = arith.constant dense<0.000000e+00> : vector<32x32xf32>
    %142 = tpu.matmul %140, %141, %cst_105 {dimension_numbers = #tpu.dot_dimension_numbers<[1], [0], [0], [1], [0, 0, 1, 1], [], []>} : vector<32x32xf32>, vector<32x32xf32>, vector<32x32xf32> -> vector<32x32xf32>
    %c0_106 = arith.constant 0 : index
    %c0_107 = arith.constant 0 : index
    %143 = vector.load %arg9[%c0_106, %c0_107] : memref<1x32xf32, #tpu.memory_space<vmem>>, vector<1x32xf32>
    %144 = vector.broadcast %143 : vector<1x32xf32> to vector<32x32xf32>
    %145 = arith.addf %142, %144 : vector<32x32xf32>
    %c0_108 = arith.constant 0 : index
    %c0_109 = arith.constant 0 : index
    %146 = vector.load %arg10[%c0_108, %c0_109] : memref<32x32xf32, #tpu.memory_space<vmem>>, vector<32x32xf32>
    tpu.vector_store %arg10[%c0_108, %c0_109], %145 {strides = array<i32>} : memref<32x32xf32, #tpu.memory_space<vmem>>, vector<32x32xf32>,
    return
  }
  func.func @transform_0(%arg0: i32) -> (i32, i32) {
    %c0_i32 = arith.constant 0 : i32
    %c0_i32_0 = arith.constant 0 : i32
    return %arg0, %c0_i32 : i32, i32
  }
  func.func @transform_1(%arg0: i32) -> (i32, i32, i32) {
    %c0_i32 = arith.constant 0 : i32
    %c0_i32_0 = arith.constant 0 : i32
    %c0_i32_1 = arith.constant 0 : i32
    return %c0_i32, %arg0, %c0_i32_0 : i32, i32, i32
  }
  func.func @transform_2(%arg0: i32) -> (i32, i32, i32) {
    %c0_i32 = arith.constant 0 : i32
    %c0_i32_0 = arith.constant 0 : i32
    %c0_i32_1 = arith.constant 0 : i32
    %c0_i32_2 = arith.constant 0 : i32
    return %c0_i32, %c0_i32_0, %c0_i32_1 : i32, i32, i32
  }
  func.func @transform_3(%arg0: i32) -> (i32, i32) {
    %c0_i32 = arith.constant 0 : i32
    %c0_i32_0 = arith.constant 0 : i32
    %c0_i32_1 = arith.constant 0 : i32
    return %c0_i32, %c0_i32_0 : i32, i32
  }
  func.func @transform_4(%arg0: i32) -> (i32, i32) {
    %c0_i32 = arith.constant 0 : i32
    %c0_i32_0 = arith.constant 0 : i32
    %c0_i32_1 = arith.constant 0 : i32
    return %c0_i32, %c0_i32_0 : i32, i32
  }
  func.func @transform_5(%arg0: i32) -> (i32, i32) {
    %c0_i32 = arith.constant 0 : i32
    %c0_i32_0 = arith.constant 0 : i32
    %c0_i32_1 = arith.constant 0 : i32
    return %c0_i32, %c0_i32_0 : i32, i32
  }
  func.func @transform_6(%arg0: i32) -> (i32, i32) {
    %c0_i32 = arith.constant 0 : i32
    %c0_i32_0 = arith.constant 0 : i32
    %c0_i32_1 = arith.constant 0 : i32
    return %c0_i32, %c0_i32_0 : i32, i32
  }
  func.func @transform_7(%arg0: i32) -> (i32, i32) {
    %c0_i32 = arith.constant 0 : i32
    %c0_i32_0 = arith.constant 0 : i32
    %c0_i32_1 = arith.constant 0 : i32
    return %c0_i32, %c0_i32_0 : i32, i32
  }
  func.func @transform_8(%arg0: i32) -> (i32, i32) {
    %c0_i32 = arith.constant 0 : i32
    %c0_i32_0 = arith.constant 0 : i32
    %c0_i32_1 = arith.constant 0 : i32
    return %c0_i32, %c0_i32_0 : i32, i32
  }
  func.func @transform_9(%arg0: i32) -> (i32, i32) {
    %c0_i32 = arith.constant 0 : i32
    %c0_i32_0 = arith.constant 0 : i32
    return %arg0, %c0_i32 : i32, i32
  }
  func.func @transform_10(%arg0: i32) -> (i32, i32, i32) {
    %c0_i32 = arith.constant 0 : i32
    %c0_i32_0 = arith.constant 0 : i32
    %c0_i32_1 = arith.constant 0 : i32
    return %c0_i32, %arg0, %c0_i32_0 : i32, i32, i32
  }
}

</mosaic_0001>

<bundles_post_ra>
// kernel: tpu_custom_call.1
= control target key start
LH: loop header
LB: loop body
LE: loop exit
PB: predicated region body
PF: predicated region fallthrough
CT: control target
= control target key end

     0   :  { %s2257_s0 = inlined_call_operand.vmem [shape: f32[64,16], index: 0, kind: input, shape index: {}]   ;;  %s2258_s1 = inlined_call_operand.hbm [shape: f32[4,64,64], index: 1, kind: input, shape index: {}]   ;;  %s2259_s2 = inlined_call_operand.vmem [shape: f32[4,8,64], index: 2, kind: input, shape index: {}]   ;;  %s2260_s3 = inlined_call_operand.vmem [shape: f32[16,64], index: 3, kind: input, shape index: {}]   ;;  %s2261_s4 = inlined_call_operand.vmem [shape: f32[1,64], index: 4, kind: input, shape index: {}]   ;;  %s2262_s5 = inlined_call_operand.hbm [shape: f32[8,32], index: 5, kind: input, shape index: {}]   ;;  %s2263_s6 = inlined_call_operand.vmem [shape: f32[1,32], index: 6, kind: input, shape index: {}]   ;;  %s2264_s7 = inlined_call_operand.vmem [shape: f32[32,32], index: 7, kind: input, shape index: {}]   ;;  %s2265_s8 = inlined_call_operand.vmem [shape: f32[1,32], index: 8, kind: input, shape index: {}]   ;;  %s2266_s9 = inlined_call_operand.vmem [shape: f32[64,32], index: 9, kind: output, shape index: {0}]   ;;  %s2267_s10 = inlined_call_operand.hbm [shape: f32[4,64,64], index: 10, kind: output, shape index: {1}]  }
   0x1   :  { %2272 = sst [smem:[#allocation20_spill]] %s2262_s5 }
   0x2   :  { %16 = vsyncpa [#allocation3], 0 }
   0x3   :  { %18 = vsyncpa [#allocation3 + $0x1], 0 }
   0x4   :  { %19 = vsyncpa [#allocation6], 0 }
   0x5   :  { %20 = vsyncpa [#allocation4], 0 }
   0x6   :  { %22 = vsyncpa [#allocation4 + $0x1], 0  ;;  %s1755_s13 = smov 0   ;;  %s1757_s14 = smov 0  }
   0x7   :  { %s1759_s15 = smov 0   ;;  %s1761_s16 = smov 0  }
   0x8 LB: > { %2273 = sst [smem:[#allocation16_spill]] %s1676_s15  ;;  %s1776_s17 = sadd.s32 4294967295, %s1680_s16   ;;  %s1680_s16 = sphi %s1761_s16, %s2284_s16   ;;  %s1676_s15 = sphi %s1759_s15, %s2286_s15   ;;  %s1672_s14 = sphi %s1757_s14, %s2288_s14   ;;  %s1668_s13 = sphi %s1755_s13, %s2287_s13  }
   0x9   : > { %2274 = sst [smem:[#allocation17_spill]] %s1680_s16  ;;  %s1353_s18 = sadd.s32 4294967294, %s1680_s16  }
   0xa   : > { %s1780_s19 = sadd.s32 1, %s1680_s16   ;;  %s61_s20 = sadd.s32 1, %s1676_s15 }
   0xb   : > { %2275 = sst [smem:[#allocation18_spill]] %s1780_s19  ;;  %s58_s21 = ssub.s32 %s1680_s16, %s1780_s19 }
   0xc   : > { %p68_p0 = scmp.ne.s32.totalorder %s1676_s15, %s1672_s14  ;;  %p59_p1 = scmp.eq.s32.totalorder %s58_s21, 0 }
   0xd   : > { %p69_p2 = scmp.eq.s32.totalorder %s1680_s16, 0  ;;  %p74_p3 = scmp.ne.s32.totalorder %s1672_s14, %s1668_s13 }
   0xe   : > { %p75_p4 = scmp.eq.s32.totalorder %s1776_s17, 0  ;;  %p271_p7 = scmp.eq.s32.totalorder %s1776_s17, 1 }
   0xf   : > { %s1792_s22 = scalar_select %p59_p1, %s1676_s15, %s61_s20  }
  0x10   : > { %p1794_p5 = por %p69_p2, %p68_p0  ;;  %p1800_p6 = por %p75_p4, %p74_p3 }
  0x11   : > { %2276 = sst [smem:[#allocation19_spill]] %s1792_s22  ;;  %p277_p8 = scmp.eq.s32.totalorder %s1353_s18, 1 }
  0x12   : > { %p1354_p9 = scmp.ge.s32.totalorder %s1680_s16, 1  ;;  %p284_p10 = scmp.lt.s32.totalorder %s1680_s16, 3 }
  0x13   : > { %p1807_p11 = por %p271_p7, %p68_p0  ;;  %p1811_p12 = por %p277_p8, %p74_p3 }
  0x14   : > { %p1815_p13 = pnand %p1354_p9, %p284_p10  ;;  %s2282_s5 = sld [smem:[#allocation20_spill]] }
  0x15   : > { %s1682_s11 = smov [#allocation5]   ;;  %p1356_p2 = scmp.ge.s32.totalorder %s1680_s16, 2 }
  0x16   : > { %p1504_p1 = pneg %p1815_p13  ;;  %s307_s12 = sshll.u32 %s1682_s11, 4  ;;  %s308_s12 = int_to_ptr.vmem [resolvable:$true] %s307_s12 }
  0x17   : > { %323 = sbr.rel (%p1356_p2) target bundleno = 42 (0x2a), region = 44 }
  0x18   : > { %p1505_p0 = pnand %p1504_p1, %p75_p4 }
  0x1a   : > { %s305_s30 = sshll.u32 %s2282_s5, 4  ;;  %s306_s30 = int_to_ptr.hbm [resolvable:$true] %s305_s30 }
  0x1b   : > { %1507 = dma.hbm_to_vmem [thread:$0]  (!%p1505_p0), %s306_s30, 128, %s308_s12, [#allocation6]  }
  0x1c   : > { %s336_s18 = sand.u32 1, %s1676_s15   ;;  %s1478_s20 = sshll.u32 %s1680_s16, 5 }
  0x1d   : > { %s1357_s21 = sshll.u32 %s336_s18, 7  ;;  %s345_s11 = scalar_lea.hbm %s2258_s1, %s1478_s20 }
  0x1e   : > { %s1485_s30 = scalar_select %p1794_p5, [#allocation0], [#allocation12] }
  0x1f   : > { %s358_s12 = sshll.u32 %s345_s11, 4  ;;  %s340_s5 = scalar_lea.vmem [#allocation2], %s1357_s21  ;;  %s359_s12 = int_to_ptr.hbm [resolvable:$true] %s358_s12 }
  0x20   : > { %s360_s22 = sshll.u32 %s340_s5, 4  ;;  %s350_s19 = sld [smem:[%s1485_s30]]   ;;  %s361_s22 = int_to_ptr.vmem [resolvable:$true] %s360_s22 }
  0x21   : > { %s1683_s15 = smov 1024   ;;  %s1684_s16 = smov 512  }
  0x22   : > { %1486 = sst [smem:[#allocation9]] (%p1794_p5), %s1683_s15  ;;  %s1685_s28 = smov 4  }
  0x23   : > { %1487 = sst [smem:[#allocation9 + $0x1]] (%p1794_p5), %s1684_s16  ;;  %s1686_s20 = smov 128  }
  0x24   : > { %1488 = sst [smem:[#allocation9 + $0x2]] (%p1794_p5), %s1685_s28  ;;  %s1687_s21 = smov 8  }
  0x25   : > { %1489 = sst [smem:[#allocation9 + $0x3]] (%p1794_p5), %s1686_s20  ;;  %s337_s11 = scalar_lea.sflag [#allocation3], %s336_s18 }
  0x26   : > { %s1360_s29 = sshll.u32 %s350_s19, 26  ;;  %1490 = sst [smem:[#allocation9 + $0x4]] (%p1794_p5), %s1686_s20 }
  0x27   : > { %s1361_s5 = sadd.s32 134217728, %s1360_s29  ;;  %1491 = sst [smem:[#allocation9 + $0x5]] (%p1794_p5), %s1687_s21 }
  0x28   : > { %s1688_s30 = smov [#allocation8]  }
  0x29   : > { %1492 = dma.general (%p1794_p5), %s359_s12, 2048, %s361_s22, %s337_s11, %s1688_s30, [#allocation9], %s1361_s5, 0  }
  0x2a PF: > { %385 = sbr.rel (%p1815_p13) target bundleno = 1178 (0x49a), region = 56  ;;  %s1853_s15 = sand.u32 (!%p1815_p13), 1, %s1672_s14  }
  0x2b   : > { %s1363_s16 = sshll.u32 (!%p1815_p13), %s1853_s15, 7  ;;  %s388_s19 = scalar_lea.sflag (!%p1815_p13), [#allocation3], %s1853_s15 }
  0x2c   : > { %s1859_s28 = scalar_lea.vmem (!%p1815_p13), [#allocation2], %s1363_s16 }
  0x2f   : > { %1655 = dma.done.wait (%p1800_p6), %s388_s19, 2048  }
  0x30   : > { %1657 = vsyncadd (%p1800_p6), %s388_s19, 4294965248 }
  0x31   : > { %1659 = dma.done.wait (%p75_p4), [#allocation6], 128  }
  0x32   : > { %1661 = vsyncadd (%p75_p4), [#allocation6], 4294967168  ;;  %s1366_s22 = sshll.u32 %s1776_s17, 2  ;;  %v463_v0 = vld [vmem:[%s2260_s3 + $0x8] sm:$0xff]  ;;  %v462_v1 = vld [vmem:[%s2260_s3] sm:$0xff]  ;;  %vm468_vm0 = vcmask 130048  }
  0x33   : > { %p445_p3 = scmp.lt.s32.totalorder %s1366_s22, 7  ;;  %495 = vmatpush.msra.mxu0 %v463_v0  ;;  %v510_v6 = vld [vmem:[%s2259_s2] sm:$0xff]  ;;  %vm515_vm1 = vcmask 64512   ;;  %s1689_s27 = smov 104   ;;  %v1404_v10 = vld [vmem:[%s2259_s2 + $0x18] sm:$0xff]  ;;  %v1378_v17 = vld [vmem:[%s2259_s2 + $0x8] sm:$0xff] }
  0x34   : > { %1480 = vmatpush.msra.mxu1 %v510_v6  ;;  %v1565_v7 = vld [vmem:[%s2261_s4] ss:$0 sm:$0xff]  ;;  %s1690_s18 = smov 112   ;;  %1481 = vmatpush.msra.mxu2 %v1378_v17  ;;  %v1391_v18 = vld [vmem:[%s2259_s2 + $0x10] sm:$0xff]  ;;  %vm557_vm2 = vcmask 523264   ;;  %s1947_s30 = scalar_lea.vmem [#allocation7], %s1363_s16 }
  0x35   : > { %s2290_s22 = smov (!%p445_p3, %s1366_s22), 7  ;;  %496 = vmatpush.msra.mxu0 %v462_v1  ;;  %1482 = vmatpush.msra.mxu3 %v1391_v18  ;;  %v511_v24 = vld [vmem:[%s1859_s28] sm:$0xff]  ;;  %v512_v30 = vld [vmem:[%s1859_s28 + $0x8] sm:$0xff]  ;;  %v513_v36 = vld [vmem:[%s1859_s28 + $0x10] sm:$0xff]  ;;  %s1692_s16 = smov 96  }
  0x36   : > { %s1367_s23 = sshll.u32 %s2290_s22, 3  ;;  %722 = vmatpush.msrb.mxu1 %v1404_v10  ;;  %v514_v40 = vld [vmem:[%s1859_s28 + $0x18] sm:$0xff]  ;;  %v1405_v43 = vld [vmem:[%s1859_s28 + $0x60] sm:$0xff]  ;;  %v1393_v54 = vld [vmem:[%s1859_s28 + $0x48] sm:$0xff]  ;;  %s1191_s22 = scalar_lea.sflag [#allocation4], %s1853_s15 }
  0x37   : > { %s448_s24 = scalar_lea.vmem %s2257_s0, %s1367_s23  ;;  %543 = vmatpush.msrb.mxu0 %v510_v6  ;;  %v1379_v46 = vld [vmem:[%s1859_s28 + $0x20] sm:$0xff]  ;;  %v1380_v55 = vld [vmem:[%s1859_s28 + $0x28] sm:$0xff] }
  0x38   : > { %v458_v2 = vld [vmem:[%s448_s24] sm:$0xff]  ;;  %v459_v3 = vld [vmem:[%s448_s24 + $0x8] sm:$0xff]  ;;  %v460_v4 = vld [vmem:[%s448_s24 + $0x10] sm:$0xff] }
  0x39   : > { %1370 = vmatmul.msk.f32.vlgmr.msra.gmra.mxu0 %vm468_vm0, %v458_v2  ;;  %v461_v5 = vld [vmem:[%s448_s24 + $0x18] sm:$0xff]  ;;  %s1691_s24 = smov 120   ;;  %v1392_v49 = vld [vmem:[%s1859_s28 + $0x40] sm:$0xff]  ;;  %v1406_v58 = vld [vmem:[%s1859_s28 + $0x68] sm:$0xff] }
  0x3a   : > { %600 = vmatpush.msra.mxu0 %v1378_v17  ;;  %v1381_v17 = vld [vmem:[%s1859_s28 + $0x30] sm:$0xff] }
  0x41   : > { %1371 = vmatmul.msk.f32.gmra.mxu0 %vm468_vm0, %v459_v3 }
  0x49   : > { %1372 = vmatmul.msk.f32.gmra.mxu0 %vm468_vm0, %v460_v4 }
  0x51   : > { %1373 = vmatmul.msk.f32.gmra.mxu0 %vm468_vm0, %v461_v5 }
  0xb6   : > { %v498_v8 = vpop.f32.mrf.mxu0 }
  0xb7   : > { %v1890_v9 = vadd.f32 %v1565_v7, %v498_v8 }
  0xb9   : > { %691 = vrot.lane.b32.xlu2 %v1890_v9, %s1689_s27  ;;  %630 = vrot.lane.b32.xlu1 %v1890_v9, %s1690_s18 }
  0xba   : > { %569 = vrot.lane.b32.xlu0 %v1890_v9, %s1691_s24  ;;  %1374 = vmatmul.msk.f32.vlgmr.msrb.gmra.mxu0 %vm515_vm1, %v1890_v9 }
  0xbb   : > { %661 = vmatpush.msrb.mxu0 %v1391_v18 }
  0xbe   : > { %v501_v11 = vpop.f32.mrf.mxu0 }
  0xbf   : > { %v1903_v12 = vadd.f32 %v1565_v7, %v501_v11 }
  0xc1   : > { %1375 = vmatmul.msk.f32.vlgmr.msra.gmra.mxu1 %vm515_vm1, %v1903_v12  ;;  %632 = vrot.lane.b32.xlu1 %v1903_v12, %s1690_s18 }
  0xc2   : > { %571 = vrot.lane.b32.xlu0 %v1903_v12, %s1691_s24 }
  0xc6   : > { %v504_v13 = vpop.f32.mrf.mxu0 }
  0xc7   : > { %v1911_v14 = vadd.f32 %v1565_v7, %v504_v13 }
  0xc9   : > { %693 = vrot.lane.b32.xlu1 %v1903_v12, %s1689_s27  ;;  %1376 = vmatmul.msk.f32.gmra.mxu1 %vm515_vm1, %v1911_v14 }
  0xca   : > { %634 = vrot.lane.b32.xlu0 %v1911_v14, %s1690_s18  ;;  %573 = vrot.lane.b32.xlu2 %v1911_v14, %s1691_s24 }
  0xce   : > { %v507_v15 = vpop.f32.mrf.mxu0 }
  0xcf   : > { %v1921_v16 = vadd.f32 %v1565_v7, %v507_v15 }
  0xd1   : > { %695 = vrot.lane.b32.xlu1 %v1911_v14, %s1689_s27  ;;  %1377 = vmatmul.msk.f32.gmra.mxu1 %vm515_vm1, %v1921_v16 }
  0xd2   : > { %636 = vrot.lane.b32.xlu0 %v1921_v16, %s1690_s18  ;;  %575 = vrot.lane.b32.xlu2 %v1921_v16, %s1691_s24 }
  0xda   : > { %697 = vrot.lane.b32.xlu2 %v1921_v16, %s1689_s27 }
 0x113   : > { %v692_v19 = vpop.permute.xlu2 %691 }
 0x114   : > { %1409 = vmatmul.msk.f32.vlgmr.msrb.gmra.mxu1 %vm515_vm1, %v692_v19 }
 0x124   : > { %v574_v25 = vpop.permute.xlu2 %573 }
 0x12b   : > { %v631_v20 = vpop.permute.xlu1 %630 }
 0x12c   : > { %v570_v21 = vpop.permute.xlu0 %569  ;;  %v576_v33 = vpop.permute.xlu2 %575 }
 0x12d   : > { %1383 = vmatmul.msk.f32.vlgmr.msra.gmra.mxu0 %vm515_vm1, %v570_v21 }
 0x133   : > { %v633_v22 = vpop.permute.xlu1 %632 }
 0x134   : > { %v572_v23 = vpop.permute.xlu0 %571  ;;  %1397 = vmatmul.msk.f32.vlgmr.msra.gmra.mxu3 %vm515_vm1, %v633_v22  ;;  %v698_v39 = vpop.permute.xlu2 %697  ;;  %v1394_v22 = vld [vmem:[%s1859_s28 + $0x50] sm:$0xff] }
 0x135   : > { %1384 = vmatmul.msk.f32.vlgmr.msra.gmra.mxu2 %vm515_vm1, %v572_v23  ;;  %1396 = vmatmul.msk.f32.vlgmr.msrb.gmra.mxu0 %vm515_vm1, %v631_v20 }
 0x137   : > { %v545_v26 = vpop.f32.mrf.mxu0 }
 0x138   : > { %v546_v27 = vadd.f32 %v545_v26, %v511_v24 }
 0x13a   : > { %558 = vst.msk [vmem:[%s1947_s30] sm:$0xff] %vm557_vm2, %v546_v27 }
 0x13b   : > { %v694_v28 = vpop.permute.xlu1 %693 }
 0x13c   : > { %v635_v29 = vpop.permute.xlu0 %634  ;;  %1410 = vmatmul.msk.f32.gmra.mxu1 %vm515_vm1, %v694_v28 }
 0x13d   : > { %1385 = vmatmul.msk.f32.gmra.mxu2 %vm515_vm1, %v574_v25  ;;  %1398 = vmatmul.msk.f32.gmra.mxu3 %vm515_vm1, %v635_v29  ;;  %v1407_v29 = vld [vmem:[%s1859_s28 + $0x70] sm:$0xff] }
 0x13e   : > { %v548_v31 = vpop.f32.mrf.mxu1 }
 0x13f   : > { %v549_v32 = vadd.f32 %v548_v31, %v512_v30 }
 0x141   : > { %559 = vst.msk [vmem:[%s1947_s30 + $0x8] sm:$0xff] %vm557_vm2, %v549_v32  ;;  %v745_v59 = vld [vmem:[%s1947_s30] sm:$0xff] }
 0x143   : > { %v696_v34 = vpop.permute.xlu1 %695 }
 0x144   : > { %v637_v35 = vpop.permute.xlu0 %636  ;;  %1411 = vmatmul.msk.f32.gmra.mxu1 %vm515_vm1, %v696_v34 }
 0x145   : > { %1386 = vmatmul.msk.f32.gmra.mxu2 %vm515_vm1, %v576_v33  ;;  %1399 = vmatmul.msk.f32.gmra.mxu3 %vm515_vm1, %v637_v35 }
 0x146   : > { %v551_v37 = vpop.f32.mrf.mxu1 }
 0x147   : > { %v1961_v38 = vadd.f32 %v551_v37, %v513_v36 }
 0x148   : > { %v746_v20 = vld [vmem:[%s1947_s30 + $0x8] sm:$0xff] }
 0x149   : > { %560 = vst.msk [vmem:[%s1947_s30 + $0x10] sm:$0xff] %vm557_vm2, %v1961_v38 }
 0x14c   : > { %1412 = vmatmul.msk.f32.gmra.mxu1 %vm515_vm1, %v698_v39 }
 0x14e   : > { %v554_v41 = vpop.f32.mrf.mxu1 }
 0x14f   : > { %v1968_v42 = vadd.f32 %v554_v41, %v514_v40 }
 0x151   : > { %561 = vst.msk [vmem:[%s1947_s30 + $0x18] sm:$0xff] %vm557_vm2, %v1968_v42 }
 0x191   : > { %v724_v44 = vpop.f32.mrf.mxu1 }
 0x192   : > { %v725_v45 = vadd.f32 %v1405_v43, %v724_v44 }
 0x194   : > { %1413 = vst.msk [vmem:[%s1947_s30 + $0x60] sm:$0xff] %vm557_vm2, %v725_v45 }
 0x19b   : > { %v1433_v61 = vld [vmem:[%s1947_s30 + $0x60] sm:$0xff] }
 0x1aa   : > { %v602_v47 = vpop.f32.mrf.mxu0 }
 0x1ab   : > { %v603_v48 = vadd.f32 %v1379_v46, %v602_v47  ;;  %v1382_v46 = vld [vmem:[%s1859_s28 + $0x38] sm:$0xff] }
 0x1ad   : > { %1387 = vst.msk [vmem:[%s1947_s30 + $0x20] sm:$0xff] %vm557_vm2, %v603_v48  ;;  %v619_v51 = vmax.f32 %v546_v27, %v603_v48 }
 0x1b2   : > { %v663_v50 = vpop.f32.mrf.mxu0 }
 0x1b3   : > { %v664_v52 = vadd.f32 %v1392_v49, %v663_v50  ;;  %v1395_v50 = vld [vmem:[%s1859_s28 + $0x58] sm:$0xff] }
 0x1b4   : > { %v1417_v60 = vld [vmem:[%s1947_s30 + $0x20] sm:$0xff] }
 0x1b5   : > { %1400 = vst.msk [vmem:[%s1947_s30 + $0x40] sm:$0xff] %vm557_vm2, %v664_v52  ;;  %v680_v53 = vmax.f32 %v619_v51, %v664_v52  ;;  %v747_v52 = vld [vmem:[%s1947_s30 + $0x10] sm:$0xff] }
 0x1b7   : > { %v741_v56 = vmax.f32 %v680_v53, %v725_v45  ;;  %v666_v57 = vpop.f32.mrf.mxu3 }
 0x1b8   : > { %v605_v62 = vpop.f32.mrf.mxu2  ;;  %v667_v63 = vadd.f32 %v1393_v54, %v666_v57 }
 0x1b9   : > { %v749_v0 = vsub.f32 %v745_v59, %v741_v56  ;;  %v773_v1 = vsub.f32 %v1417_v60, %v741_v56  ;;  %v821_v2 = vsub.f32 %v1433_v61, %v741_v56  ;;  %v606_v3 = vadd.f32 %v1380_v55, %v605_v62  ;;  %v727_v4 = vpop.f32.mrf.mxu1  ;;  %v1408_v60 = vld [vmem:[%s1859_s28 + $0x78] sm:$0xff] }
 0x1ba   : > { %1401 = vst.msk [vmem:[%s1947_s30 + $0x48] sm:$0xff] %vm557_vm2, %v667_v63  ;;  %v728_v5 = vadd.f32 %v1406_v58, %v727_v4 }
 0x1bb   : > { %v753_v6 = vmul.f32 1.442695, %v749_v0  ;;  %v777_v7 = vmul.f32 1.442695, %v773_v1  ;;  %v825_v8 = vmul.f32 1.442695, %v821_v2  ;;  %v620_v10 = vmax.f32 %v549_v32, %v606_v3 }
 0x1bc   : > { %v1425_v11 = vld [vmem:[%s1947_s30 + $0x40] sm:$0xff]  ;;  %1388 = vst.msk [vmem:[%s1947_s30 + $0x28] sm:$0xff] %vm557_vm2, %v606_v3 }
 0x1bd   : > { %1568 = vpow2.f32 %v753_v6  ;;  %v797_v13 = vsub.f32 %v1425_v11, %v741_v56  ;;  %v681_v15 = vmax.f32 %v620_v10, %v667_v63  ;;  %1414 = vst.msk [vmem:[%s1947_s30 + $0x68] sm:$0xff] %vm557_vm2, %v728_v5 }
 0x1be   : > { %1570 = vpow2.f32 %v777_v7 }
 0x1bf   : > { %v801_v18 = vmul.f32 1.442695, %v797_v13  ;;  %1572 = vpow2.f32 %v825_v8  ;;  %v742_v19 = vmax.f32 %v681_v15, %v728_v5  ;;  %v748_v15 = vld [vmem:[%s1947_s30 + $0x18] sm:$0xff] }
 0x1c0   : > { %v608_v21 = vpop.f32.mrf.mxu2  ;;  %v669_v23 = vpop.f32.mrf.mxu3 }
 0x1c1   : > { %1574 = vpow2.f32 %v801_v18  ;;  %v750_v24 = vsub.f32 %v746_v20, %v742_v19  ;;  %v1426_v25 = vld [vmem:[%s1947_s30 + $0x48] sm:$0xff]  ;;  %v609_v26 = vadd.f32 %v1381_v17, %v608_v21  ;;  %v730_v27 = vpop.f32.mrf.mxu1  ;;  %v670_v34 = vadd.f32 %v1394_v22, %v669_v23 }
 0x1c2   : > { %v798_v28 = vsub.f32 %v1426_v25, %v742_v19  ;;  %v731_v44 = vadd.f32 %v1407_v29, %v730_v27 }
 0x1c3   : > { %v1569_v30 = vpop.eup %1568  ;;  %v755_v31 = vmul.f32 1.442695, %v750_v24  ;;  %v1418_v32 = vld [vmem:[%s1947_s30 + $0x28] sm:$0xff]  ;;  %1389 = vst.msk [vmem:[%s1947_s30 + $0x30] sm:$0xff] %vm557_vm2, %v609_v26  ;;  %v621_v33 = vmax.f32 %v1961_v38, %v609_v26 }
 0x1c4   : > { %v1571_v35 = vpop.eup %1570  ;;  %761 = vst.msk [vmem:[%s1947_s30] sm:$0xff] %vm557_vm2, %v1569_v30  ;;  %v774_v36 = vsub.f32 %v1418_v32, %v742_v19  ;;  %v803_v37 = vmul.f32 1.442695, %v798_v28  ;;  %v1434_v39 = vld [vmem:[%s1947_s30 + $0x68] sm:$0xff] }
 0x1c5   : > { %v1573_v40 = vpop.eup %1572  ;;  %1421 = vst.msk [vmem:[%s1947_s30 + $0x20] sm:$0xff] %vm557_vm2, %v1571_v35  ;;  %1576 = vpow2.f32 %v755_v31  ;;  %v822_v41 = vsub.f32 %v1434_v39, %v742_v19  ;;  %v682_v43 = vmax.f32 %v621_v33, %v670_v34  ;;  %v789_v38 = vadd.f32 %v1571_v35, %v1569_v30 }
 0x1c6   : > { %1437 = vst.msk [vmem:[%s1947_s30 + $0x60] sm:$0xff] %vm557_vm2, %v1573_v40  ;;  %v779_v45 = vmul.f32 1.442695, %v774_v36  ;;  %1578 = vpow2.f32 %v803_v37 }
 0x1c7   : > { %v1575_v47 = vpop.eup %1574  ;;  %v827_v48 = vmul.f32 1.442695, %v822_v41  ;;  %1402 = vst.msk [vmem:[%s1947_s30 + $0x50] sm:$0xff] %vm557_vm2, %v670_v34  ;;  %v743_v49 = vmax.f32 %v682_v43, %v731_v44 }
 0x1c8   : > { %1429 = vst.msk [vmem:[%s1947_s30 + $0x40] sm:$0xff] %vm557_vm2, %v1575_v47  ;;  %v813_v51 = vadd.f32 %v1575_v47, %v789_v38  ;;  %1580 = vpow2.f32 %v779_v45  ;;  %v611_v53 = vpop.f32.mrf.mxu2  ;;  %v672_v54 = vpop.f32.mrf.mxu3 }
 0x1c9   : > { %1582 = vpow2.f32 %v827_v48  ;;  %1415 = vst.msk [vmem:[%s1947_s30 + $0x70] sm:$0xff] %vm557_vm2, %v731_v44  ;;  %v751_v55 = vsub.f32 %v747_v52, %v743_v49  ;;  %v612_v56 = vadd.f32 %v1382_v46, %v611_v53  ;;  %v673_v59 = vadd.f32 %v1395_v50, %v672_v54  ;;  %v733_v61 = vpop.f32.mrf.mxu1 }
 0x1ca   : > { %v2020_v57 = vadd.f32 %v1573_v40, %v813_v51  ;;  %v1419_v58 = vld [vmem:[%s1947_s30 + $0x30] sm:$0xff]  ;;  %v734_v5 = vadd.f32 %v1408_v60, %v733_v61 }
 0x1cb   : > { %v1577_v62 = vpop.eup %1576  ;;  %v757_v63 = vmul.f32 1.442695, %v751_v55  ;;  %v775_v0 = vsub.f32 %v1419_v58, %v743_v49  ;;  %1390 = vst.msk [vmem:[%s1947_s30 + $0x38] sm:$0xff] %vm557_vm2, %v612_v56  ;;  %v622_v1 = vmax.f32 %v1968_v42, %v612_v56 }
 0x1cc   : > { %v1579_v2 = vpop.eup %1578  ;;  %1584 = vrcp.f32 %v2020_v57  ;;  %762 = vst.msk [vmem:[%s1947_s30 + $0x8] sm:$0xff] %vm557_vm2, %v1577_v62  ;;  %v852_v37 = vand.u32 2147483648, %v2020_v57  ;;  %v850_v43 = vand.u32 2147483647, %v2020_v57  ;;  %vm846_vm4 = vweird.f32 %v2020_v57 }
 0x1cd   : > { %1430 = vst.msk [vmem:[%s1947_s30 + $0x48] sm:$0xff] %vm557_vm2, %v1579_v2  ;;  %1586 = vpow2.f32 %v757_v63  ;;  %v781_v3 = vmul.f32 1.442695, %v775_v0  ;;  %v683_v4 = vmax.f32 %v622_v1, %v673_v59  ;;  %v1457_v55 = vld [vmem:[%s1947_s30 + $0x60] sm:$0xff] }
 0x1ce   : > { %v1581_v6 = vpop.eup %1580  ;;  %v1427_v7 = vld [vmem:[%s1947_s30 + $0x50] sm:$0xff]  ;;  %1403 = vst.msk [vmem:[%s1947_s30 + $0x58] sm:$0xff] %vm557_vm2, %v673_v59  ;;  %v853_v48 = vor.u32 1.1754944e-38, %v852_v37  ;;  %vm851_vm6 = vcmp.eq.f32.partialorder %v850_v43, 8.507059e+37 }
 0x1cf   : > { %v1583_v42 = vpop.eup %1582  ;;  %1422 = vst.msk [vmem:[%s1947_s30 + $0x28] sm:$0xff] %vm557_vm2, %v1581_v6  ;;  %v790_v8 = vadd.f32 %v1581_v6, %v1577_v62  ;;  %1588 = vpow2.f32 %v781_v3  ;;  %v799_v10 = vsub.f32 %v1427_v7, %v743_v49  ;;  %v744_v11 = vmax.f32 %v683_v4, %v734_v5  ;;  %v1449_v56 = vld [vmem:[%s1947_s30 + $0x40] sm:$0xff] }
 0x1d0   : > { %1438 = vst.msk [vmem:[%s1947_s30 + $0x68] sm:$0xff] %vm557_vm2, %v1583_v42  ;;  %v1435_v13 = vld [vmem:[%s1947_s30 + $0x70] sm:$0xff]  ;;  %v1441_v62 = vld [vmem:[%s1947_s30 + $0x20] sm:$0xff] }
 0x1d1   : > { %v814_v17 = vadd.f32 %v1579_v2, %v790_v8  ;;  %v805_v18 = vmul.f32 1.442695, %v799_v10  ;;  %v823_v19 = vsub.f32 %v1435_v13, %v743_v49  ;;  %1416 = vst.msk [vmem:[%s1947_s30 + $0x78] sm:$0xff] %vm557_vm2, %v734_v5  ;;  %v752_v20 = vsub.f32 %v748_v15, %v744_v11  ;;  %v897_v6 = vld [vmem:[%s1947_s30] sm:$0xff] }
 0x1d2   : > { %v1585_v21 = vpop.eup %1584  ;;  %v1420_v22 = vld [vmem:[%s1947_s30 + $0x38] sm:$0xff] }
 0x1d3   : > { %v1587_v23 = vpop.eup %1586  ;;  %v2044_v24 = vadd.f32 %v1583_v42, %v814_v17  ;;  %1590 = vpow2.f32 %v805_v18  ;;  %v829_v25 = vmul.f32 1.442695, %v823_v19  ;;  %v759_v26 = vmul.f32 1.442695, %v752_v20 }
 0x1d4   : > { %763 = vst.msk [vmem:[%s1947_s30 + $0x10] sm:$0xff] %vm557_vm2, %v1587_v23  ;;  %v776_v27 = vsub.f32 %v1420_v22, %v744_v11  ;;  %v842_v28 = vmul.f32 %v1585_v21, %v2020_v57  ;;  %vm847_vm3 = vweird.f32 %v1585_v21  ;;  %v1450_v20 = vld [vmem:[%s1947_s30 + $0x48] sm:$0xff] }
 0x1d5   : > { %v1589_v29 = vpop.eup %1588  ;;  %1592 = vrcp.f32 %v2044_v24  ;;  %v1428_v30 = vld [vmem:[%s1947_s30 + $0x58] sm:$0xff]  ;;  %vm848_vm5 = vmor %vm846_vm4, %vm847_vm3  ;;  %v866_v58 = vand.u32 2147483648, %v2044_v24  ;;  %v864_v2 = vand.u32 2147483647, %v2044_v24  ;;  %vm860_vm8 = vweird.f32 %v2044_v24 }
 0x1d6   : > { %1423 = vst.msk [vmem:[%s1947_s30 + $0x30] sm:$0xff] %vm557_vm2, %v1589_v29  ;;  %v791_v31 = vadd.f32 %v1589_v29, %v1587_v23  ;;  %1594 = vpow2.f32 %v829_v25  ;;  %v783_v32 = vmul.f32 1.442695, %v776_v27  ;;  %v800_v33 = vsub.f32 %v1428_v30, %v744_v11  ;;  %v1442_v25 = vld [vmem:[%s1947_s30 + $0x28] sm:$0xff] }
 0x1d7   : > { %1596 = vpow2.f32 %v759_v26  ;;  %v843_v34 = vsub.f32 1.0, %v842_v28  ;;  %vm865_vm10 = vcmp.eq.f32.partialorder %v864_v2, 8.507059e+37  ;;  %v1458_v19 = vld [vmem:[%s1947_s30 + $0x68] sm:$0xff] }
 0x1d8   : > { %1598 = vpow2.f32 %v783_v32  ;;  %v807_v35 = vmul.f32 1.442695, %v800_v33  ;;  %v1436_v36 = vld [vmem:[%s1947_s30 + $0x78] sm:$0xff] }
 0x1d9   : > { %v1591_v39 = vpop.eup %1590  ;;  %v824_v40 = vsub.f32 %v1436_v36, %v744_v11  ;;  %v844_v41 = vmul.f32 %v1585_v21, %v843_v34  ;;  %v867_v11 = vor.u32 1.1754944e-38, %v866_v58 }
 0x1da   : > { %1431 = vst.msk [vmem:[%s1947_s30 + $0x50] sm:$0xff] %vm557_vm2, %v1591_v39  ;;  %v815_v44 = vadd.f32 %v1591_v39, %v791_v31  ;;  %1600 = vpow2.f32 %v807_v35 }
 0x1db   : > { %v1593_v38 = vpop.eup %1592  ;;  %v831_v45 = vmul.f32 1.442695, %v824_v40  ;;  %v845_v46 = vadd.f32 %v1585_v21, %v844_v41 }
 0x1dc   : > { %v1595_v47 = vpop.eup %1594  ;;  %v856_v49 = vmul.f32 %v1593_v38, %v2044_v24  ;;  %vm861_vm7 = vweird.f32 %v1593_v38  ;;  %v898_v24 = vld [vmem:[%s1947_s30 + $0x8] sm:$0xff] }
 0x1dd   : > { %v1597_v50 = vpop.eup %1596  ;;  %1439 = vst.msk [vmem:[%s1947_s30 + $0x70] sm:$0xff] %vm557_vm2, %v1595_v47  ;;  %v2062_v51 = vadd.f32 %v1595_v47, %v815_v44  ;;  %1602 = vpow2.f32 %v831_v45  ;;  %v849_v52 = vsel %vm848_vm5, %v1585_v21, %v845_v46  ;;  %vm862_vm9 = vmor %vm860_vm8, %vm861_vm7  ;;  %v1443_v46 = vld [vmem:[%s1947_s30 + $0x30] sm:$0xff] }
 0x1de   : > { %v1599_v53 = vpop.eup %1598  ;;  %764 = vst.msk [vmem:[%s1947_s30 + $0x18] sm:$0xff] %vm557_vm2, %v1597_v50  ;;  %v854_v54 = vsel %vm851_vm6, %v853_v48, %v849_v52  ;;  %v857_v57 = vsub.f32 1.0, %v856_v49 }
 0x1df   : > { %1604 = vrcp.f32 %v2062_v51  ;;  %1424 = vst.msk [vmem:[%s1947_s30 + $0x38] sm:$0xff] %vm557_vm2, %v1599_v53  ;;  %v792_v59 = vadd.f32 %v1599_v53, %v1597_v50  ;;  %v1029_v60 = vmul.f32 %v1457_v55, %v854_v54  ;;  %v981_v61 = vmul.f32 %v1449_v56, %v854_v54 }
 0x1e0   : > { %v1601_v63 = vpop.eup %1600  ;;  %v933_v0 = vmul.f32 %v1441_v62, %v854_v54  ;;  %v858_v1 = vmul.f32 %v1593_v38, %v857_v57  ;;  %v901_v8 = vmul.f32 %v897_v6, %v854_v54  ;;  %v880_v32 = vand.u32 2147483648, %v2062_v51 }
 0x1e1   : > { %1432 = vst.msk [vmem:[%s1947_s30 + $0x58] sm:$0xff] %vm557_vm2, %v1601_v63  ;;  %v816_v3 = vadd.f32 %v1601_v63, %v792_v59  ;;  %v1037_v4 = vsel %vm557_vm2, %v1029_v60, 0.0  ;;  %v989_v5 = vsel %vm557_vm2, %v981_v61, 0.0  ;;  %v878_v34 = vand.u32 2147483647, %v2062_v51  ;;  %v1451_v45 = vld [vmem:[%s1947_s30 + $0x50] sm:$0xff] }
 0x1e2   : > { %1038 = vadd.xlane.f32.xlu2 %v1037_v4  ;;  %1461 = vst.msk [vmem:[%s1947_s30 + $0x60] sm:$0xff] %vm557_vm2, %v1029_v60  ;;  %990 = vadd.xlane.f32.xlu1 %v989_v5  ;;  %v941_v7 = vsel %vm557_vm2, %v933_v0, 0.0  ;;  %v859_v42 = vadd.f32 %v1593_v38, %v858_v1  ;;  %v909_v31 = vsel %vm557_vm2, %v901_v8, 0.0  ;;  %vm874_vm12 = vweird.f32 %v2062_v51 }
 0x1e3   : > { %v1603_v10 = vpop.eup %1602  ;;  %1453 = vst.msk [vmem:[%s1947_s30 + $0x40] sm:$0xff] %vm557_vm2, %v981_v61  ;;  %942 = vadd.xlane.f32.xlu0 %v941_v7  ;;  %v881_v37 = vor.u32 1.1754944e-38, %v880_v32  ;;  %vm879_vm14 = vcmp.eq.f32.partialorder %v878_v34, 8.507059e+37 }
 0x1e4   : > { %1440 = vst.msk [vmem:[%s1947_s30 + $0x78] sm:$0xff] %vm557_vm2, %v1603_v10  ;;  %v2088_v13 = vadd.f32 %v1603_v10, %v816_v3  ;;  %v863_v15 = vsel %vm862_vm9, %v1593_v38, %v859_v42  ;;  %v1459_v43 = vld [vmem:[%s1947_s30 + $0x70] sm:$0xff] }
 0x1e5   : > { %v1605_v17 = vpop.eup %1604  ;;  %1445 = vst.msk [vmem:[%s1947_s30 + $0x20] sm:$0xff] %vm557_vm2, %v933_v0  ;;  %v868_v18 = vsel %vm865_vm10, %v867_v11, %v863_v15  ;;  %v900_v3 = vld [vmem:[%s1947_s30 + $0x18] sm:$0xff] }
 0x1e6   : > { %1606 = vrcp.f32 %v2088_v13  ;;  %v1030_v21 = vmul.f32 %v1458_v19, %v868_v18  ;;  %v982_v22 = vmul.f32 %v1450_v20, %v868_v18  ;;  %905 = vst.msk [vmem:[%s1947_s30] sm:$0xff] %vm557_vm2, %v901_v8  ;;  %v870_v23 = vmul.f32 %v1605_v17, %v2062_v51  ;;  %v899_v51 = vld [vmem:[%s1947_s30 + $0x10] sm:$0xff]  ;;  %v1444_v63 = vld [vmem:[%s1947_s30 + $0x38] sm:$0xff] }
 0x1e7   : > { %v902_v26 = vmul.f32 %v898_v24, %v868_v18  ;;  %v934_v27 = vmul.f32 %v1442_v25, %v868_v18  ;;  %vm875_vm11 = vweird.f32 %v1605_v17  ;;  %v892_v38 = vand.u32 2147483647, %v2088_v13 }
 0x1e8   : > { %1462 = vst.msk [vmem:[%s1947_s30 + $0x68] sm:$0xff] %vm557_vm2, %v1030_v21  ;;  %v1040_v28 = vsel %vm557_vm2, %v1030_v21, 0.0  ;;  %v992_v29 = vsel %vm557_vm2, %v982_v22, 0.0  ;;  %v871_v30 = vsub.f32 1.0, %v870_v23  ;;  %vm876_vm13 = vmor %vm874_vm12, %vm875_vm11  ;;  %v894_v48 = vand.u32 2147483648, %v2088_v13  ;;  %v1452_v62 = vld [vmem:[%s1947_s30 + $0x58] sm:$0xff] }
 0x1e9   : > { %1454 = vst.msk [vmem:[%s1947_s30 + $0x48] sm:$0xff] %vm557_vm2, %v982_v22  ;;  %v944_v52 = vsel %vm557_vm2, %v934_v27, 0.0  ;;  %v912_v56 = vsel %vm557_vm2, %v902_v26, 0.0  ;;  %vm888_vm0 = vweird.f32 %v2088_v13  ;;  %vm893_vm4 = vcmp.eq.f32.partialorder %v892_v38, 8.507059e+37 }
 0x1ea   : > { %1041 = vadd.xlane.f32.xlu1 %v1040_v28  ;;  %910 = vadd.xlane.f32.xlu2 %v909_v31  ;;  %v872_v33 = vmul.f32 %v1605_v17, %v871_v30  ;;  %906 = vst.msk [vmem:[%s1947_s30 + $0x8] sm:$0xff] %vm557_vm2, %v902_v26  ;;  %v895_v58 = vor.u32 1.1754944e-38, %v894_v48 }
 0x1eb   : > { %993 = vadd.xlane.f32.xlu0 %v992_v29  ;;  %1446 = vst.msk [vmem:[%s1947_s30 + $0x28] sm:$0xff] %vm557_vm2, %v934_v27  ;;  %v1460_v61 = vld [vmem:[%s1947_s30 + $0x78] sm:$0xff] }
 0x1ec   : > { %v1607_v35 = vpop.eup %1606  ;;  %v873_v36 = vadd.f32 %v1605_v17, %v872_v33 }
 0x1ed   : > { %v884_v39 = vmul.f32 %v1607_v35, %v2088_v13  ;;  %vm889_vm15 = vweird.f32 %v1607_v35 }
 0x1ee   : > { %v877_v40 = vsel %vm876_vm13, %v1605_v17, %v873_v36  ;;  %vm890_vm3 = vmor %vm888_vm0, %vm889_vm15 }
 0x1ef   : > { %v882_v41 = vsel %vm879_vm14, %v881_v37, %v877_v40  ;;  %v885_v44 = vsub.f32 1.0, %v884_v39 }
 0x1f0   : > { %v1031_v47 = vmul.f32 %v1459_v43, %v882_v41  ;;  %v983_v49 = vmul.f32 %v1451_v45, %v882_v41  ;;  %v935_v50 = vmul.f32 %v1443_v46, %v882_v41  ;;  %v2122_v54 = vmul.f32 %v899_v51, %v882_v41 }
 0x1f1   : > { %v886_v53 = vmul.f32 %v1607_v35, %v885_v44 }
 0x1f2   : > { %1463 = vst.msk [vmem:[%s1947_s30 + $0x70] sm:$0xff] %vm557_vm2, %v1031_v47  ;;  %v1043_v55 = vsel %vm557_vm2, %v1031_v47, 0.0  ;;  %945 = vadd.xlane.f32.xlu2 %v944_v52  ;;  %v947_v6 = vsel %vm557_vm2, %v935_v50, 0.0  ;;  %v995_v7 = vsel %vm557_vm2, %v983_v49, 0.0  ;;  %v915_v34 = vsel %vm557_vm2, %v2122_v54, 0.0 }
 0x1f3   : > { %1044 = vadd.xlane.f32.xlu1 %v1043_v55  ;;  %913 = vadd.xlane.f32.xlu0 %v912_v56  ;;  %v887_v57 = vadd.f32 %v1607_v35, %v886_v53  ;;  %1455 = vst.msk [vmem:[%s1947_s30 + $0x50] sm:$0xff] %vm557_vm2, %v983_v49 }
 0x1f4   : > { %1447 = vst.msk [vmem:[%s1947_s30 + $0x30] sm:$0xff] %vm557_vm2, %v935_v50 }
 0x1f5   : > { %v891_v59 = vsel %vm890_vm3, %v1607_v35, %v887_v57  ;;  %907 = vst.msk [vmem:[%s1947_s30 + $0x10] sm:$0xff] %vm557_vm2, %v2122_v54  ;;  %v1073_v57 = vld [vmem:[#allocation5] sm:$0xff] }
 0x1f6   : > { %v896_v60 = vsel %vm893_vm4, %v895_v58, %v891_v59  ;;  %1113 = vmatpush.msrb.mxu2 %v1073_v57 }
 0x1f7   : > { %v1032_v0 = vmul.f32 %v1460_v61, %v896_v60  ;;  %v984_v1 = vmul.f32 %v1452_v62, %v896_v60  ;;  %v936_v2 = vmul.f32 %v1444_v63, %v896_v60  ;;  %v904_v4 = vmul.f32 %v900_v3, %v896_v60 }
 0x1f9   : > { %1464 = vst.msk [vmem:[%s1947_s30 + $0x78] sm:$0xff] %vm557_vm2, %v1032_v0  ;;  %v1046_v5 = vsel %vm557_vm2, %v1032_v0, 0.0  ;;  %v950_v42 = vsel %vm557_vm2, %v936_v2, 0.0  ;;  %v998_v8 = vsel %vm557_vm2, %v984_v1, 0.0  ;;  %v918_v31 = vsel %vm557_vm2, %v904_v4, 0.0 }
 0x1fa   : > { %948 = vadd.xlane.f32.xlu2 %v947_v6  ;;  %1456 = vst.msk [vmem:[%s1947_s30 + $0x58] sm:$0xff] %vm557_vm2, %v984_v1 }
 0x1fb   : > { %1047 = vadd.xlane.f32.xlu1 %v1046_v5  ;;  %996 = vadd.xlane.f32.xlu0 %v995_v7  ;;  %1448 = vst.msk [vmem:[%s1947_s30 + $0x38] sm:$0xff] %vm557_vm2, %v936_v2 }
 0x1fc   : > { %908 = vst.msk [vmem:[%s1947_s30 + $0x18] sm:$0xff] %vm557_vm2, %v904_v4 }
 0x202   : > { %951 = vadd.xlane.f32.xlu2 %v950_v42 }
 0x203   : > { %999 = vadd.xlane.f32.xlu0 %v998_v8 }
 0x255   : > { %v1039_v10 = vpop.xlane.xlu2 %1038  ;;  %v991_v11 = vpop.xlane.xlu1 %990 }
 0x256   : > { %v1049_v13 = vmul.f32 %v1039_v10, %v1890_v9  ;;  %v1001_v15 = vmul.f32 %v991_v11, %v1890_v9  ;;  %v943_v17 = vpop.xlane.xlu0 %942  ;;  %v1133_v10 = vld [vmem:[%s2264_s7 + $0x10] sm:$0xff]  ;;  %v1132_v11 = vld [vmem:[%s2264_s7 + $0x8] sm:$0xff] }
 0x257   : > { %v953_v18 = vmul.f32 %v943_v17, %v1890_v9 }
 0x258   : > { %1009 = vrot.lane.b32.xlu1 %v1001_v15, %s1690_s18  ;;  %1057 = vrot.lane.b32.xlu2 %v1049_v13, %s1689_s27  ;;  %v1131_v13 = vld [vmem:[%s2264_s7] sm:$0xff] }
 0x259   : > { %961 = vrot.lane.b32.xlu0 %v953_v18, %s1691_s24  ;;  %v1566_v15 = vld [vmem:[%s2263_s6] ss:$0 sm:$0xff] }
 0x25d   : > { %v911_v19 = vpop.xlane.xlu2 %910  ;;  %v1042_v24 = vpop.xlane.xlu1 %1041 }
 0x25e   : > { %v994_v20 = vpop.xlane.xlu0 %993  ;;  %v1050_v25 = vmul.f32 %v1042_v24, %v1903_v12  ;;  %v921_v43 = vmul.f32 %v911_v19, %v1890_v9 }
 0x25f   : > { %v1002_v21 = vmul.f32 %v994_v20, %v1903_v12 }
 0x261   : > { %1011 = vrot.lane.b32.xlu2 %v1002_v21, %s1690_s18 }
 0x265   : > { %v946_v22 = vpop.xlane.xlu2 %945 }
 0x266   : > { %v954_v23 = vmul.f32 %v946_v22, %v1903_v12  ;;  %v914_v26 = vpop.xlane.xlu0 %913  ;;  %v1045_v32 = vpop.xlane.xlu1 %1044 }
 0x267   : > { %v1051_v33 = vmul.f32 %v1045_v32, %v1911_v14  ;;  %v922_v50 = vmul.f32 %v914_v26, %v1903_v12 }
 0x268   : > { %963 = vrot.lane.b32.xlu1 %v954_v23, %s1691_s24 }
 0x26d   : > { %v949_v27 = vpop.xlane.xlu2 %948 }
 0x26e   : > { %v955_v28 = vmul.f32 %v949_v27, %v1911_v14  ;;  %v997_v29 = vpop.xlane.xlu0 %996  ;;  %v1048_v39 = vpop.xlane.xlu1 %1047 }
 0x26f   : > { %v1003_v30 = vmul.f32 %v997_v29, %v1911_v14  ;;  %v1052_v41 = vmul.f32 %v1048_v39, %v1921_v16  ;;  %v1567_v29 = vld [vmem:[%s2265_s8] ss:$0 sm:$0xff] }
 0x270   : > { %1059 = vrot.lane.b32.xlu1 %v1050_v25, %s1689_s27 }
 0x275   : > { %v952_v35 = vpop.xlane.xlu2 %951 }
 0x276   : > { %v956_v36 = vmul.f32 %v952_v35, %v1921_v16  ;;  %v1000_v37 = vpop.xlane.xlu0 %999 }
 0x277   : > { %v1004_v40 = vmul.f32 %v1000_v37, %v1921_v16 }
 0x278   : > { %965 = vrot.lane.b32.xlu1 %v955_v28, %s1691_s24 }
 0x280   : > { %1013 = vrot.lane.b32.xlu1 %v1003_v30, %s1690_s18 }
 0x283   : > { %919 = vadd.xlane.f32.xlu0 %v918_v31 }
 0x288   : > { %1061 = vrot.lane.b32.xlu1 %v1051_v33, %s1689_s27 }
 0x28a   : > { %916 = vadd.xlane.f32.xlu2 %v915_v34 }
 0x290   : > { %967 = vrot.lane.b32.xlu1 %v956_v36, %s1691_s24 }
 0x297   : > { %1015 = vrot.lane.b32.xlu0 %v1004_v40, %s1690_s18 }
 0x298   : > { %1063 = vrot.lane.b32.xlu1 %v1052_v41, %s1689_s27  ;;  %s455_s27 = scalar_lea.vmem %s2266_s9, %s1367_s23 }
 0x2b2   : > { %v1058_v47 = vpop.permute.xlu2 %1057 }
 0x2bb   : > { %v1012_v52 = vpop.permute.xlu2 %1011 }
 0x2ca   : > { %v1010_v45 = vpop.permute.xlu1 %1009 }
 0x2cb   : > { %v962_v44 = vpop.permute.xlu0 %961 }
 0x2cc   : > { %v973_v38 = vadd.f32 %v962_v44, %v921_v43 }
 0x2ce   : > { %v1021_v46 = vadd.f32 %v1010_v45, %v973_v38 }
 0x2d0   : > { %v1069_v48 = vadd.f32 %v1058_v47, %v1021_v46 }
 0x2d2   : > { %1082 = vrot.lane.b32.xlu2 %v1069_v48, %s1692_s16 }
 0x2da   : > { %v964_v49 = vpop.permute.xlu1 %963 }
 0x2db   : > { %v974_v51 = vadd.f32 %v964_v49, %v922_v50 }
 0x2dd   : > { %v1022_v53 = vadd.f32 %v1012_v52, %v974_v51 }
 0x2e2   : > { %v1060_v54 = vpop.permute.xlu1 %1059 }
 0x2e3   : > { %v1070_v55 = vadd.f32 %v1060_v54, %v1022_v53 }
 0x2e5   : > { %1084 = vrot.lane.b32.xlu1 %v1070_v55, %s1692_s16 }
 0x2ea   : > { %v966_v56 = vpop.permute.xlu1 %965 }
 0x2f2   : > { %v1014_v9 = vpop.permute.xlu1 %1013 }
 0x2f6   : > { %v920_v62 = vpop.xlane.xlu0 %919 }
 0x2f7   : > { %v924_v12 = vmul.f32 %v920_v62, %v1921_v16 }
 0x2fa   : > { %v1062_v58 = vpop.permute.xlu1 %1061 }
 0x2fd   : > { %v917_v59 = vpop.xlane.xlu2 %916 }
 0x2fe   : > { %v923_v60 = vmul.f32 %v917_v59, %v1911_v14  ;;  %v1134_v14 = vld [vmem:[%s2264_s7 + $0x18] sm:$0xff] }
 0x2ff   : > { %1164 = vmatpush.msrb.mxu3 %v1134_v14 }
 0x300   : > { %v975_v61 = vadd.f32 %v966_v56, %v923_v60 }
 0x301   : > { %1165 = vmatpush.msrb.mxu3 %v1133_v10 }
 0x302   : > { %v1023_v63 = vadd.f32 %v1014_v9, %v975_v61  ;;  %v968_v0 = vpop.permute.xlu1 %967 }
 0x303   : > { %v976_v2 = vadd.f32 %v968_v0, %v924_v12  ;;  %1166 = vmatpush.msrb.mxu3 %v1132_v11 }
 0x304   : > { %v1071_v1 = vadd.f32 %v1062_v58, %v1023_v63 }
 0x305   : > { %1167 = vmatpush.msrb.mxu3 %v1131_v13 }
 0x306   : > { %1086 = vrot.lane.b32.xlu1 %v1071_v1, %s1692_s16 }
 0x309   : > { %v1016_v3 = vpop.permute.xlu0 %1015 }
 0x30a   : > { %v1024_v4 = vadd.f32 %v1016_v3, %v976_v2  ;;  %v1064_v5 = vpop.permute.xlu1 %1063 }
 0x30c   : > { %v1072_v6 = vadd.f32 %v1064_v5, %v1024_v4 }
 0x30e   : > { %1088 = vrot.lane.b32.xlu0 %v1072_v6, %s1692_s16 }
 0x32c   : > { %v1083_v7 = vpop.permute.xlu2 %1082 }
 0x32d   : > { %1465 = vmatmul.msk.f32.vlgmr.msrb.gmra.mxu2 %vm515_vm1, %v1083_v7 }
 0x357   : > { %v1085_v42 = vpop.permute.xlu1 %1084 }
 0x358   : > { %1466 = vmatmul.msk.f32.gmra.mxu2 %vm515_vm1, %v1085_v42 }
 0x378   : > { %v1087_v8 = vpop.permute.xlu1 %1086 }
 0x379   : > { %1467 = vmatmul.msk.f32.gmra.mxu2 %vm515_vm1, %v1087_v8 }
 0x380   : > { %v1089_v16 = vpop.permute.xlu0 %1088 }
 0x381   : > { %1468 = vmatmul.msk.f32.gmra.mxu2 %vm515_vm1, %v1089_v16  ;;  %vm1139_vm1 = vcmask 261120  }
 0x3b0   : > { %v1115_v17 = vpop.f32.mrf.mxu2 }
 0x3b1   : > { %v1116_v18 = vadd.f32 %v1566_v15, %v1115_v17 }
 0x3b3   : > { %v1127_v19 = vmax.f32 %v1116_v18, 0.0 }
 0x3b5   : > { %1469 = vmatmul.msk.f32.vlgmr.msrb.gmra.mxu3 %vm1139_vm1, %v1127_v19 }
 0x3db   : > { %v1118_v20 = vpop.f32.mrf.mxu2 }
 0x3dc   : > { %v1119_v21 = vadd.f32 %v1566_v15, %v1118_v20 }
 0x3de   : > { %v1128_v22 = vmax.f32 %v1119_v21, 0.0 }
 0x3e0   : > { %1470 = vmatmul.msk.f32.gmra.mxu3 %vm1139_vm1, %v1128_v22 }
 0x3fc   : > { %v1121_v23 = vpop.f32.mrf.mxu2 }
 0x3fd   : > { %v1122_v24 = vadd.f32 %v1566_v15, %v1121_v23 }
 0x3ff   : > { %v1129_v25 = vmax.f32 %v1122_v24, 0.0 }
 0x401   : > { %1471 = vmatmul.msk.f32.gmra.mxu3 %vm1139_vm1, %v1129_v25 }
 0x404   : > { %v1124_v26 = vpop.f32.mrf.mxu2 }
 0x405   : > { %v1125_v27 = vadd.f32 %v1566_v15, %v1124_v26 }
 0x407   : > { %v1130_v28 = vmax.f32 %v1125_v27, 0.0 }
 0x409   : > { %1472 = vmatmul.msk.f32.gmra.mxu3 %vm1139_vm1, %v1130_v28 }
 0x438   : > { %v1169_v30 = vpop.f32.mrf.mxu3 }
 0x439   : > { %v1170_v31 = vadd.f32 %v1567_v29, %v1169_v30 }
 0x43b   : > { %1181 = vst.msk [vmem:[%s455_s27] sm:$0xff] %vm1139_vm1, %v1170_v31 }
 0x463   : > { %v1172_v32 = vpop.f32.mrf.mxu3 }
 0x464   : > { %v1173_v33 = vadd.f32 %v1567_v29, %v1172_v32 }
 0x466   : > { %1182 = vst.msk [vmem:[%s455_s27 + $0x8] sm:$0xff] %vm1139_vm1, %v1173_v33 }
 0x484   : > { %v1175_v34 = vpop.f32.mrf.mxu3 }
 0x485   : > { %v1176_v35 = vadd.f32 %v1567_v29, %v1175_v34 }
 0x487   : > { %1183 = vst.msk [vmem:[%s455_s27 + $0x10] sm:$0xff] %vm1139_vm1, %v1176_v35 }
 0x48c   : > { %v1178_v36 = vpop.f32.mrf.mxu3 }
 0x48d   : > { %v1179_v37 = vadd.f32 %v1567_v29, %v1178_v36 }
 0x48f   : > { %1184 = vst.msk [vmem:[%s455_s27 + $0x18] sm:$0xff] %vm1139_vm1, %v1179_v37 }
 0x490   : > { %s1479_s23 = sshll.u32 %s1776_s17, 5  ;;  %s1217_s18 = sshll.u32 %s1947_s30, 4  ;;  %s1218_s18 = int_to_ptr.vmem [resolvable:$true] %s1217_s18 }
 0x491   : > { %s1206_s20 = scalar_lea.hbm %s2267_s10, %s1479_s23  ;;  %s1693_s5 = smov 512  }
 0x492   : > { %s1219_s29 = sshll.u32 %s1206_s20, 4  ;;  %1496 = sst [smem:[#allocation11]] (%p1807_p11), %s1693_s5  ;;  %s1220_s29 = int_to_ptr.hbm [resolvable:$true] %s1219_s29 }
 0x493   : > { %s1694_s15 = smov 1024   ;;  %s1695_s21 = smov 4  }
 0x494   : > { %1497 = sst [smem:[#allocation11 + $0x1]] (%p1807_p11), %s1694_s15  ;;  %s1696_s17 = smov 128  }
 0x495   : > { %1498 = sst [smem:[#allocation11 + $0x2]] (%p1807_p11), %s1695_s21  ;;  %s1697_s30 = smov 8  }
 0x496   : > { %1499 = sst [smem:[#allocation11 + $0x3]] (%p1807_p11), %s1696_s17  ;;  %s1698_s11 = smov [#allocation10]  }
 0x497   : > { %1500 = sst [smem:[#allocation11 + $0x4]] (%p1807_p11), %s1696_s17  ;;  %s1699_s16 = smov 0  }
 0x498   : > { %1501 = sst [smem:[#allocation11 + $0x5]] (%p1807_p11), %s1697_s30 }
 0x499   : > { %1502 = dma.general (%p1807_p11), %s1218_s18, 2048, %s1220_s29, %s1191_s22, %s1698_s11, [#allocation11], %s1699_s16, 0  }
 0x49a PF: > { %s1255_s19 = sand.u32 1, %s1668_s13   ;;  %p1509_p4 = pnand %p1356_p2, %p1811_p12 }
 0x49b   : > { %s1256_s27 = scalar_lea.sflag [#allocation4], %s1255_s19 }
 0x49c   : > { %p1510_p5 = pneg %p1509_p4 }
 0x49e   : > { %1663 = dma.done.wait (%p1510_p5), %s1256_s27, 2048  }
 0x49f   : > { %1665 = vsyncadd (%p1510_p5), %s1256_s27, 4294965248  ;;  %s2284_s16 = sld [smem:[#allocation18_spill]]  ;;  %s2287_s13 = smov %s1672_s14 }
 0x4a0   : > { %s2285_s23 = sld [smem:[#allocation16_spill]] }
 0x4a1   : > { %s2286_s15 = sld [smem:[#allocation19_spill]] }
 0x4a5   : > { %p25_p6 = scmp.ge.s32.totalorder %s2284_s16, 4  }
 0x4a6   : > { %s2288_s14 = smov %s2285_s23 }
 0x4a7   :  { %27 = sbr.rel (!%p25_p6) target bundleno = 8 (0x8), region = 139 }
 0x4ac   :  { %1262 = vsyncpa [#allocation3], 1 }
 0x4ad   :  { %1264 = vsyncpa [#allocation3 + $0x1], 1 }
 0x4ae   :  { %1265 = vsyncpa [#allocation6], 1 }
 0x4af   :  { %1266 = vsyncpa [#allocation4], 1 }
 0x4b0   :  { %1268 = vsyncpa [#allocation4 + $0x1], 1 }

</bundles_post_ra>
